<compile_context>
chip_gen: v7x
topology: tpu7x:2x2x1
jax: 0.10.0
libtpu: 0.0.40
codegen_flags: <defaults>
</compile_context>

<pallas_src>
import functools

import jax
import jax.numpy as jnp
import numpy as np
from jax.experimental import pallas as pl
from jax.experimental.pallas import tpu as pltpu

_LANE = 128


def _round_up(v, m):
    return ((v + m - 1) // m) * m


def _region_cvm_kernel(xw_ref, wpg_ref, ww_ref, bpg_ref, bw_ref, out_ref,
                       *, M, Cip, approx_recip):
    # xw_ref : (Pb, N, Cp)   Pb patches, N = 4*M pixels in window-major order
    #                        (pixel n = w*M + m, w = 2x2-pool window slot)
    # wpg_ref: (Cp, 3*Cip)   fused [theta | phi | g] 1x1-conv weights
    # ww_ref : (Cip, Cp)     W 1x1-conv weights
    Pb, N, Cp = xw_ref.shape
    cd = xw_ref.dtype

    x = xw_ref[...]                                        # (Pb, N, Cp)
    xflat = x.reshape(Pb * N, Cp)

    # --- fused theta|phi|g projection: one MXU matmul, one bias add ----------
    proj = jnp.dot(xflat, wpg_ref[...], preferred_element_type=jnp.float32)
    proj = proj + bpg_ref[...]                             # (Pb*N, 3*Cip) f32

    theta = proj[:, :Cip].reshape(Pb, N, Cip)              # window-major pixels
    pgw = proj[:, Cip:].reshape(Pb, 4, M, 2 * Cip)         # grouped by pool window
    # 2x2 max-pool of the (pointwise) phi/g convs == max over the 4 window pixels
    pg = jnp.maximum(jnp.maximum(pgw[:, 0], pgw[:, 1]),
                     jnp.maximum(pgw[:, 2], pgw[:, 3]))    # (Pb, M, 2*Cip)
    phi = pg[:, :, :Cip]
    g = pg[:, :, Cip:]

    # --- attention, batched over the Pb patches of this block ----------------
    f = jnp.einsum("pnc,pmc->pnm", theta.astype(cd), phi.astype(cd),
                   preferred_element_type=jnp.float32)     # (Pb, N, M)
    f = f - jnp.max(f, axis=-1, keepdims=True)
    e = jnp.exp(f)
    inv = pl.reciprocal(jnp.sum(e, axis=-1, keepdims=True), approx=approx_recip)
    f_div = e * inv
    y = jnp.einsum("pnm,pmc->pnc", f_div.astype(cd), g.astype(cd),
                   preferred_element_type=jnp.float32)     # (Pb, N, Cip) f32

    # --- W(y) + residual (f32) ------------------------------------------------
    wy = jnp.dot(y.reshape(Pb * N, Cip).astype(cd), ww_ref[...],
                 preferred_element_type=jnp.float32) + bw_ref[...]
    out = wy.reshape(Pb, N, Cp) + x.astype(jnp.float32)
    out_ref[...] = out.astype(out_ref.dtype)


def _vmem_budget_bytes():
    """Generation-aware VMEM budget: ~96 MiB on 128 MiB parts (v5e/v6e),
    ~48 MiB on 64 MiB-per-core parts (v7x)."""
    try:
        cap = int(pltpu.get_tpu_info().vmem_capacity_bytes)
    except Exception:
        cap = 64 * 1024 * 1024          # conservative fallback (v7x per-core)
    return max(32 * 1024 * 1024, min(cap * 3 // 4, 100 * 1024 * 1024))


def _choose_block_patches(P, N, Cp, Cip, M, compute_dtype, vmem_budget_bytes):
    """Largest divisor of P whose block fits the (shared) VMEM budget.
    Prefers an even number of grid steps (both v7x TensorCores busy) and
    Pb*N row counts that are multiples of 256 (full MXU passes)."""
    f32 = 4
    cd = jnp.dtype(compute_dtype).itemsize

    # grid-invariant operands are single-buffered (memory_space=VMEM specs)
    weight_bytes = (Cp * 3 * Cip + Cip * Cp) * cd + (3 * Cip + Cp) * f32
    budget = vmem_budget_bytes - weight_bytes - (2 << 20)   # fixed headroom
    if budget <= 0:
        return 1

    # conservative flat-sum of every live buffer per patch
    io = N * Cp * cd * 2 + N * Cp * f32 * 2          # dbl-buffered input + output
    proj = N * 3 * Cip * f32                         # fused projection (f32)
    theta = N * Cip * (f32 + cd)                     # slice + MXU-operand cast
    pool = M * 2 * Cip * (f32 + cd) * 2              # pgw regroup + pooled pg
    attn = N * M * (3 * f32 + cd)                    # f, e, f_div (+ cast)
    y = N * Cip * (f32 + cd)
    wy_out = N * Cp * f32 * 2                        # wy + out block
    resid = N * Cp * f32 if cd != f32 else 0         # residual upcast (bf16 path)
    per_patch = io + proj + theta + pool + attn + y + wy_out + resid

    fits = [pb for pb in range(1, P + 1)
            if P % pb == 0 and pb * per_patch <= budget]
    if not fits:
        return 1
    even = [pb for pb in fits if (P // pb) % 2 == 0]         # both TCs on v7x
    cands = even or fits
    aligned = [pb for pb in cands if (pb * N) % 256 == 0]    # MXU pass width
    cands = aligned or cands
    return max(cands)


def region_cvm_pallas(x, params, grid=(2, 2), compute_dtype=jnp.float32,
                      block_patches=None, exact_reciprocal=False):
    """x: (B, C, H, W) float32, NCHW (PyTorch convention)."""
    B, C, H, W = x.shape
    gr, gc = grid
    assert H % gr == 0 and W % gc == 0
    ph, pw = H // gr, W // gc
    assert ph % 2 == 0 and pw % 2 == 0, "MaxPool2d(2) needs even patch dims"
    ph2, pw2 = ph // 2, pw // 2
    N = ph * pw                      # pixels per patch
    M = ph2 * pw2                    # 2x2 pooling windows per patch
    P = B * gr * gc                  # total patches
    Ci = params["wt"].shape[1]

    Cp = _round_up(C, _LANE)         # lane-dense channel dims
    Cip = _round_up(Ci, _LANE)

    # --- single window-major, channels-last, channel-padded activation tensor
    # axes after transpose: (B, gr, gc, wr, wc, r2, c2, C); pixel n = w*M + m
    xw = (x.reshape(B, C, gr, ph2, 2, gc, pw2, 2)
            .transpose(0, 2, 5, 4, 7, 3, 6, 1)
            .reshape(P, N, C))
    if Cp != C:
        xw = jnp.pad(xw, ((0, 0), (0, 0), (0, Cp - C)))
    # NOTE: in the bf16 path the residual uses these bf16-rounded activations.
    xw = xw.astype(compute_dtype)

    # --- fused / zero-padded weights & biases (pads don't perturb results) ---
    def _padw(w):                     # (C, Ci) -> (Cp, Cip)
        return jnp.pad(w, ((0, Cp - C), (0, Cip - Ci)))

    def _padb(b):                     # (1, Ci) -> (1, Cip)
        return jnp.pad(b, ((0, 0), (0, Cip - Ci)))

    wpg = jnp.concatenate([_padw(params["wt"]), _padw(params["wp"]),
                           _padw(params["wg"])], axis=1).astype(compute_dtype)
    ww = jnp.pad(params["ww"],
                 ((0, Cip - Ci), (0, Cp - C))).astype(compute_dtype)
    bpg = jnp.concatenate([_padb(params["bt"]), _padb(params["bp"]),
                           _padb(params["bg"])], axis=1).astype(jnp.float32)
    bw = jnp.pad(params["bw"], ((0, 0), (0, Cp - C))).astype(jnp.float32)

    # --- one generation-aware VMEM budget for chooser AND compiler limit -----
    vmem_limit = _vmem_budget_bytes()
    Pb = block_patches or _choose_block_patches(P, N, Cp, Cip, M,
                                                compute_dtype, vmem_limit)
    assert P % Pb == 0
    grid_steps = P // Pb

    approx_recip = not exact_reciprocal
    kernel = functools.partial(_region_cvm_kernel, M=M, Cip=Cip,
                               approx_recip=approx_recip)

    # grid-invariant weights/biases: whole-array VMEM residency, single copy
    # (no double-buffering, no per-step re-DMA).
    const_spec = lambda: pl.BlockSpec(memory_space=pltpu.MemorySpace.VMEM)

    out = pl.pallas_call(
        kernel,
        out_shape=jax.ShapeDtypeStruct((P, N, Cp), x.dtype),
        grid_spec=pltpu.PrefetchScalarGridSpec(
            num_scalar_prefetch=0,
            grid=(grid_steps,),
            in_specs=[
                pl.BlockSpec((Pb, N, Cp), lambda i: (i, 0, 0)),  # activations
                const_spec(),                                     # wt|wp|wg
                const_spec(),                                     # ww
                const_spec(),                                     # bt|bp|bg
                const_spec(),                                     # bw
            ],
            out_specs=pl.BlockSpec((Pb, N, Cp), lambda i: (i, 0, 0)),
        ),
        compiler_params=pltpu.CompilerParams(
            # patch axis is fully independent; "parallel" lets megacore shard it
            # (grid_steps is kept even by the chooser so both v7x TCs get work).
            dimension_semantics=("parallel",),
            vmem_limit_bytes=vmem_limit),
    )(xw, wpg, ww, bpg, bw)

    # --- undo the pixel permutation, drop channel padding, back to NCHW ------
    z = (out[:, :, :C]
            .reshape(B, gr, gc, 2, 2, ph2, pw2, C)
            .transpose(0, 7, 1, 5, 3, 2, 6, 4)
            .reshape(B, C, H, W))
    return z


def region_cvm_ref(x, params, grid=(2, 2)):
    """Pure-JAX reference mirroring the PyTorch forward exactly."""
    B, C, H, W = x.shape
    gr, gc = grid
    ph, pw = H // gr, W // gc
    Ci = params["wt"].shape[1]

    def conv1x1(v, w, b):
        return jnp.einsum("bchw,co->bohw", v, w) + b.reshape(1, -1, 1, 1)

    def pool2(v):
        b, c, h, w = v.shape
        return v.reshape(b, c, h // 2, 2, w // 2, 2).max(axis=(3, 5))

    def cvm(xp):
        b = xp.shape[0]
        g_x = pool2(conv1x1(xp, params["wg"], params["bg"].reshape(-1)))
        g_x = g_x.reshape(b, Ci, -1).transpose(0, 2, 1)
        theta_x = conv1x1(xp, params["wt"], params["bt"].reshape(-1))
        theta_x = theta_x.reshape(b, Ci, -1).transpose(0, 2, 1)
        phi_x = pool2(conv1x1(xp, params["wp"], params["bp"].reshape(-1)))
        phi_x = phi_x.reshape(b, Ci, -1)
        f = theta_x @ phi_x
        f_div = jax.nn.softmax(f, axis=-1)
        y = (f_div @ g_x).transpose(0, 2, 1).reshape(b, Ci, ph, pw)
        w_y = conv1x1(y, params["ww"], params["bw"].reshape(-1))
        return w_y + xp

    rows = []
    for i in range(gr):
        cols = []
        for j in range(gc):
            patch = x[:, :, i * ph:(i + 1) * ph, j * pw:(j + 1) * pw]
            cols.append(cvm(patch))
        rows.append(jnp.concatenate(cols, axis=3))
    return jnp.concatenate(rows, axis=2)


if __name__ == "__main__":
    B, C, H, W = 2, 4, 16, 16
    grid = (2, 2)                       # RegionCVM default is [6, 6]; small here
    Ci = max(C // 2, 1)                 # inter_channels = in_channels // 2

    key = jax.random.PRNGKey(0)
    keys = jax.random.split(key, 9)
    x = jax.random.normal(keys[0], (B, C, H, W), jnp.float32)

    scale = 0.1
    params = dict(
        wt=jax.random.normal(keys[1], (C, Ci), jnp.float32) * scale,
        wp=jax.random.normal(keys[2], (C, Ci), jnp.float32) * scale,
        wg=jax.random.normal(keys[3], (C, Ci), jnp.float32) * scale,
        # PyTorch zero-inits W (bn_layer=False); nonzero here to exercise kernel.
        ww=jax.random.normal(keys[4], (Ci, C), jnp.float32) * scale,
        bt=jax.random.normal(keys[5], (1, Ci), jnp.float32) * scale,
        bp=jax.random.normal(keys[6], (1, Ci), jnp.float32) * scale,
        bg=jax.random.normal(keys[7], (1, Ci), jnp.float32) * scale,
        bw=jax.random.normal(keys[8], (1, C), jnp.float32) * scale,
    )

    ref = region_cvm_ref(x, params, grid)

    # f32 + exact reciprocal: exact math (bit-level differences only).
    out_exact = jax.block_until_ready(
        region_cvm_pallas(x, params, grid, compute_dtype=jnp.float32,
                          exact_reciprocal=True))
    np.testing.assert_allclose(np.asarray(out_exact), np.asarray(ref),
                               rtol=1e-5, atol=1e-5)

    # default f32 path (approx EUP reciprocal in the softmax denominator).
    out_f32 = jax.block_until_ready(
        region_cvm_pallas(x, params, grid, compute_dtype=jnp.float32))
    np.testing.assert_allclose(np.asarray(out_f32), np.asarray(ref),
                               rtol=2e-3, atol=2e-3)

    # bf16 MXU operands (f32 accumulation/softmax/residual) -> loose check.
    # (softmax rows don't sum exactly to 1 with approx reciprocal; residual is
    #  bf16-rounded — both within the 3e-2 tolerance.)
    out_bf16 = jax.block_until_ready(
        region_cvm_pallas(x, params, grid, compute_dtype=jnp.bfloat16))
    np.testing.assert_allclose(np.asarray(out_bf16), np.asarray(ref),
                               rtol=3e-2, atol=3e-2)

    print("KERNEL_OK")
</pallas_src>

<mosaic_0001>
module attributes {stable_mosaic.version = 11 : i64} {
  func.func @_region_cvm_kernel(%arg0: i32, %arg1: memref<4x64x128xf32, #tpu.memory_space<vmem>>, %arg2: memref<128x384xf32, #tpu.memory_space<vmem>>, %arg3: memref<128x128xf32, #tpu.memory_space<vmem>>, %arg4: memref<1x384xf32, #tpu.memory_space<vmem>>, %arg5: memref<1x128xf32, #tpu.memory_space<vmem>>, %arg6: memref<4x64x128xf32, #tpu.memory_space<vmem>>) attributes {dimension_semantics = [#tpu.dimension_semantics<parallel>], iteration_bounds = array<i64: 2>, scalar_prefetch = 0 : i64, scratch_operands = 0 : i64, tpu.core_type = #tpu.core_type<tc>, window_params = [{transform_indices = @transform_0, window_bounds = array<i64: 4, 64, 128>}, {pipeline_mode = #tpu.pipeline_mode<synchronous>, transform_indices = @transform_1, window_bounds = array<i64: 128, 384>}, {pipeline_mode = #tpu.pipeline_mode<synchronous>, transform_indices = @transform_2, window_bounds = array<i64: 128, 128>}, {pipeline_mode = #tpu.pipeline_mode<synchronous>, transform_indices = @transform_3, window_bounds = array<i64: 1, 384>}, {pipeline_mode = #tpu.pipeline_mode<synchronous>, transform_indices = @transform_4, window_bounds = array<i64: 1, 128>}, {transform_indices = @transform_5, window_bounds = array<i64: 4, 64, 128>}]} {
    %c0 = arith.constant 0 : index
    %c0_0 = arith.constant 0 : index
    %c0_1 = arith.constant 0 : index
    %0 = vector.load %arg1[%c0, %c0_0, %c0_1] : memref<4x64x128xf32, #tpu.memory_space<vmem>>, vector<4x64x128xf32>
    %1 = vector.shape_cast %0 : vector<4x64x128xf32> to vector<256x128xf32>
    %c0_2 = arith.constant 0 : index
    %c0_3 = arith.constant 0 : index
    %2 = vector.load %arg2[%c0_2, %c0_3] : memref<128x384xf32, #tpu.memory_space<vmem>>, vector<128x384xf32>
    %cst = arith.constant dense<0.000000e+00> : vector<256x384xf32>
    %3 = tpu.matmul %1, %2, %cst {dimension_numbers = #tpu.dot_dimension_numbers<[1], [0], [0], [1], [0, 0, 1, 1], [], []>} : vector<256x128xf32>, vector<128x384xf32>, vector<256x384xf32> -> vector<256x384xf32>
    %c0_4 = arith.constant 0 : index
    %c0_5 = arith.constant 0 : index
    %4 = vector.load %arg4[%c0_4, %c0_5] : memref<1x384xf32, #tpu.memory_space<vmem>>, vector<1x384xf32>
    %5 = vector.broadcast %4 : vector<1x384xf32> to vector<256x384xf32>
    %6 = arith.addf %3, %5 : vector<256x384xf32>
    %7 = vector.extract_strided_slice %6 {offsets = [0, 0], sizes = [256, 128], strides = [1, 1]} : vector<256x384xf32> to vector<256x128xf32>
    %8 = vector.shape_cast %7 : vector<256x128xf32> to vector<4x64x128xf32>
    %9 = vector.extract_strided_slice %6 {offsets = [0, 128], sizes = [256, 256], strides = [1, 1]} : vector<256x384xf32> to vector<256x256xf32>
    %10 = vector.shape_cast %9 : vector<256x256xf32> to vector<4x4x16x256xf32>
    %11 = vector.extract_strided_slice %10 {offsets = [0, 0, 0, 0], sizes = [4, 1, 16, 256], strides = [1, 1, 1, 1]} : vector<4x4x16x256xf32> to vector<4x1x16x256xf32>
    %12 = vector.shape_cast %11 : vector<4x1x16x256xf32> to vector<4x16x256xf32>
    %13 = vector.extract_strided_slice %10 {offsets = [0, 1, 0, 0], sizes = [4, 1, 16, 256], strides = [1, 1, 1, 1]} : vector<4x4x16x256xf32> to vector<4x1x16x256xf32>
    %14 = vector.shape_cast %13 : vector<4x1x16x256xf32> to vector<4x16x256xf32>
    %15 = arith.maximumf %12, %14 : vector<4x16x256xf32>
    %16 = vector.extract_strided_slice %10 {offsets = [0, 2, 0, 0], sizes = [4, 1, 16, 256], strides = [1, 1, 1, 1]} : vector<4x4x16x256xf32> to vector<4x1x16x256xf32>
    %17 = vector.shape_cast %16 : vector<4x1x16x256xf32> to vector<4x16x256xf32>
    %18 = vector.extract_strided_slice %10 {offsets = [0, 3, 0, 0], sizes = [4, 1, 16, 256], strides = [1, 1, 1, 1]} : vector<4x4x16x256xf32> to vector<4x1x16x256xf32>
    %19 = vector.shape_cast %18 : vector<4x1x16x256xf32> to vector<4x16x256xf32>
    %20 = arith.maximumf %17, %19 : vector<4x16x256xf32>
    %21 = arith.maximumf %15, %20 : vector<4x16x256xf32>
    %22 = vector.extract_strided_slice %21 {offsets = [0, 0, 0], sizes = [4, 16, 128], strides = [1, 1, 1]} : vector<4x16x256xf32> to vector<4x16x128xf32>
    %23 = vector.extract_strided_slice %21 {offsets = [0, 0, 128], sizes = [4, 16, 128], strides = [1, 1, 1]} : vector<4x16x256xf32> to vector<4x16x128xf32>
    "tpu.trace_start"() <{level = 10 : i32, message = "pnc,pmc->pnm"}> : () -> ()
    %cst_6 = arith.constant dense<0.000000e+00> : vector<4x64x16xf32>
    %24 = tpu.matmul %8, %22, %cst_6 {dimension_numbers = #tpu.dot_dimension_numbers<[2], [2], [1], [1], [0, 0, 0, 1, 1, 1], [0], [0]>} : vector<4x64x128xf32>, vector<4x16x128xf32>, vector<4x64x16xf32> -> vector<4x64x16xf32>
    "tpu.trace_stop"() : () -> ()
    %cst_7 = arith.constant dense<0xFF800000> : vector<4x64xf32>
    %25 = vector.multi_reduction <maximumf>, %24, %cst_7 [2] : vector<4x64x16xf32> to vector<4x64xf32>
    %26 = vector.shape_cast %25 : vector<4x64xf32> to vector<4x64x1xf32>
    %27 = vector.broadcast %26 : vector<4x64x1xf32> to vector<4x64x16xf32>
    %28 = arith.subf %24, %27 : vector<4x64x16xf32>
    %29 = math.exp %28 : vector<4x64x16xf32>
    %cst_8 = arith.constant dense<0.000000e+00> : vector<4x64xf32>
    %30 = vector.multi_reduction <add>, %29, %cst_8 [2] : vector<4x64x16xf32> to vector<4x64xf32>
    %31 = vector.shape_cast %30 : vector<4x64xf32> to vector<4x64x1xf32>
    %32 = tpu.reciprocal %31 : vector<4x64x1xf32> -> vector<4x64x1xf32>
    %33 = vector.broadcast %32 : vector<4x64x1xf32> to vector<4x64x16xf32>
    %34 = arith.mulf %29, %33 : vector<4x64x16xf32>
    "tpu.trace_start"() <{level = 10 : i32, message = "pnm,pmc->pnc"}> : () -> ()
    %cst_9 = arith.constant dense<0.000000e+00> : vector<4x64x128xf32>
    %35 = tpu.matmul %34, %23, %cst_9 {dimension_numbers = #tpu.dot_dimension_numbers<[2], [1], [1], [2], [0, 0, 0, 1, 1, 2], [0], [0]>} : vector<4x64x16xf32>, vector<4x16x128xf32>, vector<4x64x128xf32> -> vector<4x64x128xf32>
    "tpu.trace_stop"() : () -> ()
    %36 = vector.shape_cast %35 : vector<4x64x128xf32> to vector<256x128xf32>
    %c0_10 = arith.constant 0 : index
    %c0_11 = arith.constant 0 : index
    %37 = vector.load %arg3[%c0_10, %c0_11] : memref<128x128xf32, #tpu.memory_space<vmem>>, vector<128x128xf32>
    %cst_12 = arith.constant dense<0.000000e+00> : vector<256x128xf32>
    %38 = tpu.matmul %36, %37, %cst_12 {dimension_numbers = #tpu.dot_dimension_numbers<[1], [0], [0], [1], [0, 0, 1, 1], [], []>} : vector<256x128xf32>, vector<128x128xf32>, vector<256x128xf32> -> vector<256x128xf32>
    %c0_13 = arith.constant 0 : index
    %c0_14 = arith.constant 0 : index
    %39 = vector.load %arg5[%c0_13, %c0_14] : memref<1x128xf32, #tpu.memory_space<vmem>>, vector<1x128xf32>
    %40 = vector.broadcast %39 : vector<1x128xf32> to vector<256x128xf32>
    %41 = arith.addf %38, %40 : vector<256x128xf32>
    %42 = vector.shape_cast %41 : vector<256x128xf32> to vector<4x64x128xf32>
    %43 = arith.addf %42, %0 : vector<4x64x128xf32>
    %c0_15 = arith.constant 0 : index
    %c0_16 = arith.constant 0 : index
    %c0_17 = arith.constant 0 : index
    %44 = vector.load %arg6[%c0_15, %c0_16, %c0_17] : memref<4x64x128xf32, #tpu.memory_space<vmem>>, vector<4x64x128xf32>
    tpu.vector_store %arg6[%c0_15, %c0_16, %c0_17], %43 {strides = array<i32>} : memref<4x64x128xf32, #tpu.memory_space<vmem>>, vector<4x64x128xf32>,
    return
  }
  func.func @transform_0(%arg0: i32) -> (i32, i32, i32) {
    %c0_i32 = arith.constant 0 : i32
    %c0_i32_0 = arith.constant 0 : i32
    %c0_i32_1 = arith.constant 0 : i32
    return %arg0, %c0_i32, %c0_i32_0 : i32, i32, i32
  }
  func.func @transform_1(%arg0: i32) -> (i32, i32) {
    %c0_i32 = arith.constant 0 : i32
    %c0_i32_0 = arith.constant 0 : i32
    %c0_i32_1 = arith.constant 0 : i32
    return %c0_i32, %c0_i32_0 : i32, i32
  }
  func.func @transform_2(%arg0: i32) -> (i32, i32) {
    %c0_i32 = arith.constant 0 : i32
    %c0_i32_0 = arith.constant 0 : i32
    %c0_i32_1 = arith.constant 0 : i32
    return %c0_i32, %c0_i32_0 : i32, i32
  }
  func.func @transform_3(%arg0: i32) -> (i32, i32) {
    %c0_i32 = arith.constant 0 : i32
    %c0_i32_0 = arith.constant 0 : i32
    %c0_i32_1 = arith.constant 0 : i32
    return %c0_i32, %c0_i32_0 : i32, i32
  }
  func.func @transform_4(%arg0: i32) -> (i32, i32) {
    %c0_i32 = arith.constant 0 : i32
    %c0_i32_0 = arith.constant 0 : i32
    %c0_i32_1 = arith.constant 0 : i32
    return %c0_i32, %c0_i32_0 : i32, i32
  }
  func.func @transform_5(%arg0: i32) -> (i32, i32, i32) {
    %c0_i32 = arith.constant 0 : i32
    %c0_i32_0 = arith.constant 0 : i32
    %c0_i32_1 = arith.constant 0 : i32
    return %arg0, %c0_i32, %c0_i32_0 : i32, i32, i32
  }
}

</mosaic_0001>

<bundles_post_ra>
// kernel: tpu_custom_call.1
= control target key start
LH: loop header
LB: loop body
LE: loop exit
PB: predicated region body
PF: predicated region fallthrough
CT: control target
= control target key end

     0   :  { %10 = vsyncpa [#allocation3], 0  ;;  %s4778_s0 = inlined_call_operand.hbm [shape: f32[8,64,128], index: 0, kind: input, shape index: {}]   ;;  %s4779_s1 = inlined_call_operand.hbm [shape: f32[128,384], index: 1, kind: input, shape index: {}]   ;;  %s4780_s2 = inlined_call_operand.hbm [shape: f32[128,128], index: 2, kind: input, shape index: {}]   ;;  %s4781_s3 = inlined_call_operand.vmem [shape: f32[1,384], index: 3, kind: input, shape index: {}]   ;;  %s4782_s4 = inlined_call_operand.vmem [shape: f32[1,128], index: 4, kind: input, shape index: {}]   ;;  %s4783_s5 = inlined_call_operand.hbm [shape: f32[8,64,128], index: 5, kind: output, shape index: {}]  }
   0x1   :  { %12 = vsyncpa [#allocation3 + $0x1], 0 }
   0x2   :  { %13 = vsyncpa [#allocation6], 0 }
   0x3   :  { %14 = vsyncpa [#allocation4], 0 }
   0x4   :  { %16 = vsyncpa [#allocation4 + $0x1], 0  ;;  %s3708_s18 = smov 0   ;;  %s3710_s19 = smov 0  }
   0x5   :  { %s3712_s20 = smov 0   ;;  %s3714_s21 = smov 0  }
   0x6 LB: > { %s3729_s22 = sadd.s32 4294967295, %s3665_s21   ;;  %s2610_s23 = sadd.s32 4294967294, %s3665_s21   ;;  %s3665_s21 = sphi %s3714_s21, %s4803_s21   ;;  %s3661_s20 = sphi %s3712_s20, %s4802_s20   ;;  %s3657_s19 = sphi %s3710_s19, %s4801_s19   ;;  %s3653_s18 = sphi %s3708_s18, %s4800_s18  }
   0x7   : > { %p42_p0 = scmp.ne.s32.totalorder %s3657_s19, %s3653_s18  ;;  %p4784_p1 = scmp.eq.s32.totalorder %s3729_s22, 0 }
   0x8   : > { %p156_p3 = scmp.eq.s32.totalorder %s2610_s23, 1  ;;  %p2611_p5 = scmp.ge.s32.totalorder %s3665_s21, 1 }
   0x9   : > { %p3738_p4 = por %p4784_p1, %p42_p0  ;;  %p163_p7 = scmp.lt.s32.totalorder %s3665_s21, 3 }
   0xa   : > { %p3743_p6 = por %p156_p3, %p42_p0  ;;  %s3667_s27 = smov [#allocation5]  }
   0xb   : > { %s4787_s24 = scalar_select %p3738_p4, 1, 0 }
   0xc   : > { %s4788_s25 = scalar_select %p3743_p6, 1, 0 }
   0xd   : > { %p3748_p8 = pnand %p2611_p5, %p163_p7  ;;  %s175_s28 = sshll.u32 %s3667_s27, 4  ;;  %s3752_s28 = int_to_ptr.vmem [resolvable:$true] %s175_s28 }
   0xe   : > { %s3668_s30 = smov [#allocation7]   ;;  %s3509_s9 = scalar_lea.hbm %s4779_s1, 6144 }
   0xf   : > { %p3287_p9 = pneg %p3748_p8  ;;  %s188_s6 = sshll.u32 %s3668_s30, 4  ;;  %s3763_s6 = int_to_ptr.vmem [resolvable:$true] %s188_s6 }
  0x10   : > { %p3510_p12 = scmp.ne.s32.totalorder %s4779_s1, %s3509_s9  ;;  %p3516_p5 = scmp.lt.u32.totalorder %s3509_s9, %s4779_s1 }
  0x11   : > { %p3759_p11 = pnand %p3287_p9, %p4784_p1 }
  0x13   : > { %p3511_p13 = pneg %p3759_p11 }
  0x15   : > { %p3512_p0 = pnand %p3511_p13, %p3510_p12 }
  0x17   : > { %p3513_p3 = pneg %p3512_p0 }
  0x19   : > { %p3518_p7 = pnand %p3516_p5, %p3513_p3 }
  0x1b   : > { %3521 = shalt.err (!%p3518_p7)
}
  0x1c   : > { %s3522_s14 = scalar_lea.vmem %s3752_s28, 6144  ;;  %p3530_p2 = scmp.lt.s32.totalorder %s3752_s28, %s3752_s28 }
  0x1d   : > { %p3523_p9 = scmp.ne.s32.totalorder %s3752_s28, %s3522_s14  ;;  %p3531_p12 = scmp.lt.s32.totalorder %s3522_s14, %s3522_s14 }
  0x1f   : > { %p3525_p10 = pnand %p3523_p9, %p3511_p13  ;;  %p3532_p0 = por %p3531_p12, %p3530_p2 }
  0x21   : > { %p3526_p1 = pneg %p3525_p10 }
  0x23   : > { %p3533_p6 = pnand %p3532_p0, %p3526_p1 }
  0x25   : > { %3536 = shalt.err (!%p3533_p6)
}
  0x26   : > { %s3669_s15 = smov 384   ;;  %s3670_s16 = smov 24  }
  0x27   : > { %3290 = dma.hbm_to_vmem [thread:$0]  (!%p3759_p11), %s4779_s1, 6144, %s3752_s28, [#allocation6], %s3669_s15, %s3669_s15, %s3670_s16  }
  0x28   : > { %s3537_s7 = scalar_lea.hbm %s4780_s2, 2048 }
  0x29   : > { %p3538_p2 = scmp.ne.s32.totalorder %s4780_s2, %s3537_s7  ;;  %p3544_p10 = scmp.lt.u32.totalorder %s3537_s7, %s4780_s2 }
  0x2b   : > { %p3540_p1 = pnand %p3538_p2, %p3511_p13 }
  0x2d   : > { %p3541_p6 = pneg %p3540_p1 }
  0x2f   : > { %p3546_p3 = pnand %p3544_p10, %p3541_p6 }
  0x31   : > { %3549 = shalt.err (!%p3546_p3)
}
  0x32   : > { %s3550_s28 = scalar_lea.vmem %s3763_s6, 2048  ;;  %p3558_p12 = scmp.lt.s32.totalorder %s3763_s6, %s3763_s6 }
  0x33   : > { %p3551_p5 = scmp.ne.s32.totalorder %s3763_s6, %s3550_s28  ;;  %p3559_p0 = scmp.lt.s32.totalorder %s3550_s28, %s3550_s28 }
  0x35   : > { %p3553_p7 = pnand %p3551_p5, %p3511_p13  ;;  %p3560_p2 = por %p3559_p0, %p3558_p12 }
  0x37   : > { %p3554_p9 = pneg %p3553_p7 }
  0x39   : > { %p3561_p1 = pnand %p3560_p2, %p3554_p9 }
  0x3b   : > { %3564 = shalt.err (!%p3561_p1)
}
  0x3c   : > { %s3671_s12 = smov 128   ;;  %s3672_s13 = smov 8  }
  0x3d   : > { %3293 = dma.hbm_to_vmem [thread:$0]  (!%p3759_p11), %s4780_s2, 2048, %s3763_s6, [#allocation6], %s3671_s12, %s3671_s12, %s3672_s13  }
  0x3e   : > { %s3821_s16 = sadd.s32 1, %s3665_s21   ;;  %s29_s23 = sadd.s32 1, %s3661_s20 }
  0x3f   : > { %s26_s17 = ssub.s32 %s3665_s21, %s3821_s16  ;;  %p36_p6 = scmp.ne.s32.totalorder %s3661_s20, %s3657_s19 }
  0x40   : > { %p27_p13 = scmp.eq.s32.totalorder %s26_s17, 0  ;;  %p37_p10 = scmp.eq.s32.totalorder %s3665_s21, 0 }
  0x41   : > { %p4791_p5 = scmp.eq.s32.totalorder %s3729_s22, 1  ;;  %p3304_p9 = scmp.lt.s32.totalorder %s3665_s21, 2 }
  0x42   : > { %s3830_s27 = scalar_select %p27_p13, %s3661_s20, %s29_s23  }
  0x43   : > { %p38_p3 = por %p37_p10, %p36_p6  ;;  %p3834_p7 = por %p4791_p5, %p36_p6 }
  0x44   : > { %s208_s30 = sand.u32 1, %s3661_s20   ;;  %s2664_s6 = sshll.u32 %s3665_s21, 12 }
  0x45   : > { %s4792_s29 = scalar_select %p3834_p7, 1, 0 }
  0x46   : > { %s2615_s7 = sshll.u32 %s208_s30, 8  ;;  %s3844_s10 = scalar_lea.hbm %s4778_s0, %s2664_s6 }
  0x47   : > { %s212_s11 = scalar_lea.vmem [#allocation2], %s2615_s7  ;;  %p3848_p11 = pnand %p3304_p9, %p38_p3 }
  0x48   : > { %s220_s28 = sshll.u32 %s212_s11, 4  ;;  %s3852_s15 = scalar_lea.sflag [#allocation3], %s208_s30  ;;  %s3846_s28 = int_to_ptr.vmem [resolvable:$true] %s220_s28 }
  0x49   : > { %s3565_s17 = scalar_lea.hbm %s3844_s10, 4096  ;;  %p3567_p0 = pneg %p3848_p11 }
  0x4a   : > { %p3566_p12 = scmp.ne.s32.totalorder %s3844_s10, %s3565_s17  ;;  %s3570_s6 = scalar_lea.hbm %s4778_s0, 8192 }
  0x4b   : > { %p3571_p13 = scmp.lt.u32.totalorder %s3844_s10, %s4778_s0  ;;  %p3572_p6 = scmp.lt.u32.totalorder %s3570_s6, %s3565_s17 }
  0x4c   : > { %p3568_p2 = pnand %p3567_p0, %p3566_p12  ;;  %p3574_p3 = scmp.lt.u32.totalorder %s3565_s17, %s3844_s10 }
  0x4d   : > { %p3573_p10 = por %p3572_p6, %p3571_p13 }
  0x4e   : > { %p3569_p1 = pneg %p3568_p2 }
  0x4f   : > { %p3575_p5 = por %p3574_p3, %p3573_p10 }
  0x51   : > { %p3576_p9 = pnand %p3575_p5, %p3569_p1 }
  0x53   : > { %3579 = shalt.err (!%p3576_p9)
}
  0x54   : > { %s3580_s30 = scalar_lea.vmem %s3846_s28, 4096  ;;  %s3673_s11 = smov [#allocation2]  }
  0x55   : > { %p3581_p12 = scmp.ne.s32.totalorder %s3846_s28, %s3580_s30  ;;  %s3585_s23 = sshll.u32 %s3673_s11, 4  ;;  %s3586_s23 = int_to_ptr.vmem [resolvable:$false] %s3585_s23 }
  0x56   : > { %s3587_s7 = scalar_lea.vmem %s3586_s23, 8192  ;;  %p3588_p4 = scmp.lt.s32.totalorder %s3846_s28, %s3586_s23 }
  0x57   : > { %p3583_p2 = pnand %p3581_p12, %p3567_p0  ;;  %p3589_p13 = scmp.lt.s32.totalorder %s3587_s7, %s3580_s30 }
  0x59   : > { %p3584_p7 = pneg %p3583_p2  ;;  %p3590_p6 = por %p3589_p13, %p3588_p4 }
  0x5b   : > { %p3591_p10 = pnand %p3590_p6, %p3584_p7 }
  0x5d   : > { %3594 = shalt.err (!%p3591_p10)
}
  0x5e   : > { %3297 = dma.hbm_to_vmem [thread:$0]  (!%p3848_p11), %s3844_s10, 4096, %s3846_s28, %s3852_s15, %s3671_s12, %s3671_s12, %s3672_s13  }
  0x5f   : > { %232 = sbr.rel (%p3748_p8) target bundleno = 1456 (0x5b0), region = 40  ;;  %s3886_s17 = sand.u32 (!%p3748_p8), 1, %s3657_s19  }
  0x60   : > { %s2620_s6 = sshll.u32 (!%p3748_p8), %s3886_s17, 8  ;;  %s235_s8 = scalar_lea.sflag (!%p3748_p8), [#allocation3], %s3886_s17 }
  0x61   : > { %s3892_s14 = scalar_lea.vmem (!%p3748_p8), [#allocation2], %s2620_s6  ;;  %p4794_p4 = scmp.ne.s32.totalorder (!%p3748_p8), %s4787_s24, 0 }
  0x66   : > { %3640 = dma.done.wait (%p4794_p4), %s235_s8, 4096  }
  0x67   : > { %3642 = vsyncadd (%p4794_p4), %s235_s8, 4294963200  ;;  %p4795_p7 = scmp.eq.s32.totalorder %s3729_s22, 0 }
  0x69   : > { %3644 = dma.done.wait (%p4795_p7), [#allocation6], 8192   ;;  %p4796_p8 = pmov %p4795_p7 }
  0x6a   : > { %v3674_v0 = vmov 0.0   ;;  %v308_v1 = vld [vmem:[#allocation5 + $0x8] sm:$0xff]  ;;  %v311_v2 = vld [vmem:[#allocation5 + $0x20] sm:$0xff]  ;;  %v310_v5 = vld [vmem:[#allocation5 + $0x18] sm:$0xff]  ;;  %vm1322_vm0 = vcmask 130048   ;;  %s4633_s10 = scalar_lea.vmem [#allocation8], %s2620_s6 }
  0x6b   : > { %3646 = vsyncadd (%p4796_p8), [#allocation6], 4294959104  ;;  %436 = vmatprep.mubr.f32.mxu0 %v3674_v0  ;;  %568 = vmatprep.mubr.f32.mxu1 %v3674_v0  ;;  %v307_v3 = vld [vmem:[#allocation5] sm:$0xff]  ;;  %v3131_v4 = vpack.c.bf16 %v311_v2, %v308_v1  ;;  %v314_v6 = vld [vmem:[#allocation5 + $0x38] sm:$0xff]  ;;  %s2666_s28 = sshll.u32 %s3729_s22, 12  ;;  %s2518_s15 = sshll.u32 %s4633_s10, 4  ;;  %s4731_s15 = int_to_ptr.vmem [resolvable:$true] %s2518_s15 }
  0x6c   : > { %v317_v7 = vld [vmem:[#allocation5 + $0x50] sm:$0xff]  ;;  %v3133_v8 = vpack.c.bf16 %v310_v5, %v307_v3  ;;  %v316_v11 = vld [vmem:[#allocation5 + $0x48] sm:$0xff]  ;;  %v323_v13 = vld [vmem:[#allocation5 + $0x80] sm:$0xff]  ;;  %s4729_s11 = scalar_lea.hbm %s4783_s5, %s2666_s28  ;;  %s2504_s22 = scalar_lea.sflag [#allocation4], %s3886_s17 }
  0x6d   : > { %v3135_v9 = vpack.c.bf16 %v317_v7, %v314_v6  ;;  %v313_v10 = vld [vmem:[#allocation5 + $0x30] sm:$0xff]  ;;  %v320_v12 = vld [vmem:[#allocation5 + $0x68] sm:$0xff]  ;;  %3132 = vmatprep.subr.bf16.mxu0 %v3131_v4  ;;  %3259 = vmatprep.subr.bf16.mxu1 %v3131_v4  ;;  %v319_v16 = vld [vmem:[#allocation5 + $0x60] sm:$0xff]  ;;  %s3595_s23 = scalar_lea.vmem %s4731_s15, 4096  ;;  %p4797_p0 = scmp.ne.s32.totalorder %s4792_s29, 0 }
  0x6e   : > { %3134 = vmatpush1.bf16.msra.mxu0 %v3133_v8  ;;  %v3137_v14 = vpack.c.bf16 %v316_v11, %v313_v10  ;;  %3267 = vmatpush1.bf16.msra.mxu1 %v3133_v8  ;;  %v3139_v15 = vpack.c.bf16 %v323_v13, %v320_v12  ;;  %v322_v17 = vld [vmem:[#allocation5 + $0x78] sm:$0xff]  ;;  %v329_v19 = vld [vmem:[#allocation5 + $0xb0] sm:$0xff]  ;;  %v328_v23 = vld [vmem:[#allocation5 + $0xa8] sm:$0xff]  ;;  %p3596_p11 = scmp.ne.s32.totalorder %s4731_s15, %s3595_s23  ;;  %s3675_s7 = smov [#allocation8]  }
  0x6f   : > { %3136 = vmatprep.subr.bf16.mxu0 %v3135_v9  ;;  %3260 = vmatprep.subr.bf16.mxu1 %v3135_v9  ;;  %v326_v18 = vld [vmem:[#allocation5 + $0x98] sm:$0xff]  ;;  %v3141_v20 = vpack.c.bf16 %v322_v17, %v319_v16  ;;  %v325_v22 = vld [vmem:[#allocation5 + $0x90] sm:$0xff]  ;;  %v332_v24 = vld [vmem:[#allocation5 + $0xc8] sm:$0xff]  ;;  %s3599_s6 = sshll.u32 %s3675_s7, 4  ;;  %s3600_s6 = int_to_ptr.vmem [resolvable:$false] %s3599_s6 }
  0x70   : > { %v3143_v21 = vpack.c.bf16 %v329_v19, %v326_v18  ;;  %v335_v25 = vld [vmem:[#allocation5 + $0xe0] sm:$0xff]  ;;  %v3145_v26 = vpack.c.bf16 %v328_v23, %v325_v22  ;;  %v334_v29 = vld [vmem:[#allocation5 + $0xd8] sm:$0xff]  ;;  %v341_v31 = vld [vmem:[#allocation5 + $0x110] sm:$0xff]  ;;  %p3597_p1 = pnand %p3596_p11, %p4797_p0  ;;  %s3601_s8 = scalar_lea.vmem %s3600_s6, 8192 }
  0x71   : > { %v3147_v27 = vpack.c.bf16 %v335_v25, %v332_v24  ;;  %v331_v28 = vld [vmem:[#allocation5 + $0xc0] sm:$0xff]  ;;  %v338_v30 = vld [vmem:[#allocation5 + $0xf8] sm:$0xff]  ;;  %v337_v34 = vld [vmem:[#allocation5 + $0xf0] sm:$0xff]  ;;  %p3602_p5 = scmp.lt.s32.totalorder %s4731_s15, %s3600_s6  ;;  %p3603_p9 = scmp.lt.s32.totalorder %s3601_s8, %s3595_s23 }
  0x72   : > { %3138 = vmatpush1.bf16.msra.mxu0 %v3137_v14  ;;  %3268 = vmatpush1.bf16.msra.mxu1 %v3137_v14  ;;  %v3149_v32 = vpack.c.bf16 %v334_v29, %v331_v28  ;;  %v3151_v33 = vpack.c.bf16 %v341_v31, %v338_v30  ;;  %v340_v35 = vld [vmem:[#allocation5 + $0x108] sm:$0xff]  ;;  %v347_v37 = vld [vmem:[#allocation5 + $0x140] sm:$0xff]  ;;  %v346_v41 = vld [vmem:[#allocation5 + $0x138] sm:$0xff]  ;;  %p3598_p3 = pneg %p3597_p1 }
  0x73   : > { %3140 = vmatprep.subr.bf16.mxu0 %v3139_v15  ;;  %3261 = vmatprep.subr.bf16.mxu1 %v3139_v15  ;;  %v344_v36 = vld [vmem:[#allocation5 + $0x128] sm:$0xff]  ;;  %v3153_v38 = vpack.c.bf16 %v340_v35, %v337_v34  ;;  %v343_v40 = vld [vmem:[#allocation5 + $0x120] sm:$0xff]  ;;  %v350_v42 = vld [vmem:[#allocation5 + $0x158] sm:$0xff]  ;;  %p3604_p12 = por %p3603_p9, %p3602_p5 }
  0x74   : > { %v3155_v39 = vpack.c.bf16 %v347_v37, %v344_v36  ;;  %v353_v43 = vld [vmem:[#allocation5 + $0x170] sm:$0xff]  ;;  %v3157_v44 = vpack.c.bf16 %v346_v41, %v343_v40  ;;  %v352_v47 = vld [vmem:[#allocation5 + $0x168] sm:$0xff]  ;;  %v315_v52 = vld [vmem:[#allocation5 + $0x40] sm:$0xff] }
  0x75   : > { %v3159_v45 = vpack.c.bf16 %v353_v43, %v350_v42  ;;  %v349_v46 = vld [vmem:[#allocation5 + $0x150] sm:$0xff]  ;;  %v312_v49 = vld [vmem:[#allocation5 + $0x28] sm:$0xff]  ;;  %v318_v53 = vld [vmem:[#allocation5 + $0x58] sm:$0xff]  ;;  %p3605_p2 = pnand %p3604_p12, %p3598_p3 }
  0x76   : > { %3142 = vmatpush1.bf16.msra.mxu0 %v3141_v20  ;;  %3269 = vmatpush1.bf16.msra.mxu1 %v3141_v20  ;;  %v309_v48 = vld [vmem:[#allocation5 + $0x10] sm:$0xff]  ;;  %v3161_v50 = vpack.c.bf16 %v352_v47, %v349_v46  ;;  %v3905_v54 = vld [vmem:[%s3892_s14] sm:$0xff]  ;;  %v3167_v56 = vpack.c.bf16 %v318_v53, %v315_v52  ;;  %v324_v58 = vld [vmem:[#allocation5 + $0x88] sm:$0xff] }
  0x77   : > { %3144 = vmatprep.subr.bf16.mxu0 %v3143_v21  ;;  %3262 = vmatprep.subr.bf16.mxu1 %v3143_v21  ;;  %v3163_v51 = vpack.c.bf16 %v312_v49, %v309_v48  ;;  %v3908_v55 = vld [vmem:[%s3892_s14 + $0xb0] sm:$0xff]  ;;  %v3914_v59 = vld [vmem:[%s3892_s14 + $0x8] sm:$0xff]  ;;  %v3918_v60 = vld [vmem:[%s3892_s14 + $0xb8] sm:$0xff] }
  0x78   : > { %v321_v57 = vld [vmem:[#allocation5 + $0x70] sm:$0xff]  ;;  %v327_v62 = vld [vmem:[#allocation5 + $0xa0] sm:$0xff]  ;;  %v330_v63 = vld [vmem:[#allocation5 + $0xb8] sm:$0xff] }
  0x79   : > { %v3171_v61 = vpack.c.bf16 %v324_v58, %v321_v57  ;;  %v3924_v1 = vld [vmem:[%s3892_s14 + $0x10] sm:$0xff]  ;;  %v3928_v2 = vld [vmem:[%s3892_s14 + $0xc0] sm:$0xff]  ;;  %v3175_v3 = vpack.c.bf16 %v330_v63, %v327_v62  ;;  %v336_v5 = vld [vmem:[#allocation5 + $0xe8] sm:$0xff] }
  0x7a   : > { %3146 = vmatpush1.bf16.msra.mxu0 %v3145_v26  ;;  %3270 = vmatpush1.bf16.msra.mxu1 %v3145_v26  ;;  %v333_v4 = vld [vmem:[#allocation5 + $0xd0] sm:$0xff]  ;;  %v3934_v6 = vld [vmem:[%s3892_s14 + $0x18] sm:$0xff]  ;;  %v3938_v7 = vld [vmem:[%s3892_s14 + $0xc8] sm:$0xff] }
  0x7b   : > { %3148 = vmatprep.subr.bf16.mxu0 %v3147_v27  ;;  %3263 = vmatprep.subr.bf16.mxu1 %v3147_v27  ;;  %v3179_v8 = vpack.c.bf16 %v336_v5, %v333_v4  ;;  %v339_v9 = vld [vmem:[#allocation5 + $0x100] sm:$0xff]  ;;  %v342_v10 = vld [vmem:[#allocation5 + $0x118] sm:$0xff]  ;;  %v3946_v12 = vld [vmem:[%s3892_s14 + $0xd0] sm:$0xff] }
  0x7c   : > { %v279_v11 = vld [vmem:[%s3892_s14 + $0x20] sm:$0xff]  ;;  %v3183_v13 = vpack.c.bf16 %v342_v10, %v339_v9  ;;  %v345_v14 = vld [vmem:[#allocation5 + $0x130] sm:$0xff]  ;;  %v348_v15 = vld [vmem:[#allocation5 + $0x148] sm:$0xff] }
  0x7d   : > { %v280_v16 = vld [vmem:[%s3892_s14 + $0x28] sm:$0xff]  ;;  %v3953_v17 = vld [vmem:[%s3892_s14 + $0xd8] sm:$0xff]  ;;  %v3187_v18 = vpack.c.bf16 %v348_v15, %v345_v14  ;;  %v351_v19 = vld [vmem:[#allocation5 + $0x160] sm:$0xff] }
  0x7e   : > { %3150 = vmatpush1.bf16.msra.mxu0 %v3149_v32  ;;  %3271 = vmatpush1.bf16.msra.mxu1 %v3149_v32  ;;  %v354_v20 = vld [vmem:[#allocation5 + $0x178] sm:$0xff]  ;;  %v281_v21 = vld [vmem:[%s3892_s14 + $0x30] sm:$0xff]  ;;  %v3960_v22 = vld [vmem:[%s3892_s14 + $0xe0] sm:$0xff] }
  0x7f   : > { %3152 = vmatprep.subr.bf16.mxu0 %v3151_v33  ;;  %3264 = vmatprep.subr.bf16.mxu1 %v3151_v33  ;;  %v3191_v23 = vpack.c.bf16 %v354_v20, %v351_v19  ;;  %v282_v24 = vld [vmem:[%s3892_s14 + $0x38] sm:$0xff]  ;;  %v3967_v25 = vld [vmem:[%s3892_s14 + $0xe8] sm:$0xff]  ;;  %v283_v26 = vld [vmem:[%s3892_s14 + $0x40] sm:$0xff] }
  0x80   : > { %v3974_v27 = vld [vmem:[%s3892_s14 + $0xf0] sm:$0xff]  ;;  %v284_v28 = vld [vmem:[%s3892_s14 + $0x48] sm:$0xff]  ;;  %v3981_v29 = vld [vmem:[%s3892_s14 + $0xf8] sm:$0xff] }
  0x81   : > { %v285_v30 = vld [vmem:[%s3892_s14 + $0x50] sm:$0xff]  ;;  %v286_v31 = vld [vmem:[%s3892_s14 + $0x58] sm:$0xff]  ;;  %v287_v32 = vld [vmem:[%s3892_s14 + $0x60] sm:$0xff] }
  0x82   : > { %3154 = vmatpush1.bf16.msra.mxu0 %v3153_v38  ;;  %3272 = vmatpush1.bf16.msra.mxu1 %v3153_v38  ;;  %v288_v33 = vld [vmem:[%s3892_s14 + $0x68] sm:$0xff]  ;;  %v289_v34 = vld [vmem:[%s3892_s14 + $0x70] sm:$0xff]  ;;  %v290_v35 = vld [vmem:[%s3892_s14 + $0x78] sm:$0xff] }
  0x83   : > { %3156 = vmatprep.subr.bf16.mxu0 %v3155_v39  ;;  %3265 = vmatprep.subr.bf16.mxu1 %v3155_v39  ;;  %v291_v36 = vld [vmem:[%s3892_s14 + $0x80] sm:$0xff]  ;;  %v292_v37 = vld [vmem:[%s3892_s14 + $0x88] sm:$0xff]  ;;  %v293_v38 = vld [vmem:[%s3892_s14 + $0x90] sm:$0xff] }
  0x84   : > { %v294_v39 = vld [vmem:[%s3892_s14 + $0x98] sm:$0xff]  ;;  %v295_v40 = vld [vmem:[%s3892_s14 + $0xa0] sm:$0xff]  ;;  %v296_v41 = vld [vmem:[%s3892_s14 + $0xa8] sm:$0xff] }
  0x86   : > { %3158 = vmatpush1.bf16.msra.mxu0 %v3157_v44  ;;  %3273 = vmatpush1.bf16.msra.mxu1 %v3157_v44  ;;  %v4028_v44 = vld [vmem:[%s4781_s3] sm:$0x7] }
  0x87   : > { %3160 = vmatprep.subr.bf16.mxu0 %v3159_v45  ;;  %3266 = vmatprep.subr.bf16.mxu1 %v3159_v45 }
  0x8a   : > { %3162 = vmatpush1.bf16.msra.mxu0 %v3161_v50  ;;  %3274 = vmatpush1.bf16.msra.mxu1 %v3161_v50 }
  0x8b   : > { %3164 = vmatprep.subr.bf16.mxu1 %v3163_v51 }
  0x8d   : > { %437 = vmatmul.mubr.f32.vlgmr.msra.gmra.mrb[0].mxu0 %v3905_v54  ;;  %569 = vmatmul.mubr.f32.vlgmr.msra.gmra.mrb[0].mxu1 %v3908_v55 }
  0x8e   : > { %442 = vmatprep.mubr.f32.mxu0 %v3674_v0  ;;  %574 = vmatprep.mubr.f32.mxu1 %v3674_v0 }
  0x8f   : > { %3166 = vmatpush3.bf16.msra.mxu1 %v3163_v51 }
  0x90   : > { %3168 = vmatprep.subr.bf16.mxu1 %v3167_v56 }
  0x91   : > { %443 = vmatmul.mubr.f32.gmra.mrb[2].mxu0 %v3914_v59  ;;  %575 = vmatmul.mubr.f32.gmra.mrb[2].mxu1 %v3918_v60 }
  0x92   : > { %448 = vmatprep.mubr.f32.mxu0 %v3674_v0  ;;  %580 = vmatprep.mubr.f32.mxu1 %v3674_v0 }
  0x93   : > { %3170 = vmatpush3.bf16.msra.mxu1 %v3167_v56 }
  0x94   : > { %3172 = vmatprep.subr.bf16.mxu1 %v3171_v61 }
  0x95   : > { %449 = vmatmul.mubr.f32.gmra.mrb[4].mxu0 %v3924_v1  ;;  %581 = vmatmul.mubr.f32.gmra.mrb[4].mxu1 %v3928_v2 }
  0x96   : > { %454 = vmatprep.mubr.f32.mxu0 %v3674_v0  ;;  %586 = vmatprep.mubr.f32.mxu1 %v3674_v0 }
  0x97   : > { %3174 = vmatpush3.bf16.msra.mxu1 %v3171_v61 }
  0x98   : > { %3176 = vmatprep.subr.bf16.mxu1 %v3175_v3 }
  0x99   : > { %455 = vmatmul.mubr.f32.gmra.mrb[6].mxu0 %v3934_v6  ;;  %587 = vmatmul.mubr.f32.gmra.mrb[6].mxu1 %v3938_v7 }
  0x9a   : > { %460 = vmatprep.mubr.f32.mxu0 %v3674_v0  ;;  %592 = vmatprep.mubr.f32.mxu1 %v3674_v0 }
  0x9b   : > { %3178 = vmatpush3.bf16.msra.mxu1 %v3175_v3 }
  0x9c   : > { %3180 = vmatprep.subr.bf16.mxu1 %v3179_v8 }
  0x9d   : > { %461 = vmatmul.mubr.f32.gmra.mrb[8].mxu0 %v279_v11  ;;  %593 = vmatmul.mubr.f32.gmra.mrb[8].mxu1 %v3946_v12 }
  0x9e   : > { %466 = vmatprep.mubr.f32.mxu0 %v3674_v0  ;;  %598 = vmatprep.mubr.f32.mxu1 %v3674_v0 }
  0x9f   : > { %3182 = vmatpush3.bf16.msra.mxu1 %v3179_v8 }
  0xa0   : > { %3184 = vmatprep.subr.bf16.mxu1 %v3183_v13 }
  0xa1   : > { %467 = vmatmul.mubr.f32.gmra.mrb[10].mxu0 %v280_v16  ;;  %599 = vmatmul.mubr.f32.gmra.mrb[10].mxu1 %v3953_v17 }
  0xa2   : > { %472 = vmatprep.mubr.f32.mxu0 %v3674_v0  ;;  %604 = vmatprep.mubr.f32.mxu1 %v3674_v0 }
  0xa3   : > { %3186 = vmatpush3.bf16.msra.mxu1 %v3183_v13 }
  0xa4   : > { %3188 = vmatprep.subr.bf16.mxu1 %v3187_v18 }
  0xa5   : > { %473 = vmatmul.mubr.f32.gmra.mrb[12].mxu0 %v281_v21  ;;  %605 = vmatmul.mubr.f32.gmra.mrb[12].mxu1 %v3960_v22 }
  0xa6   : > { %478 = vmatprep.mubr.f32.mxu0 %v3674_v0  ;;  %610 = vmatprep.mubr.f32.mxu1 %v3674_v0 }
  0xa7   : > { %3190 = vmatpush3.bf16.msra.mxu1 %v3187_v18 }
  0xa8   : > { %3192 = vmatprep.subr.bf16.mxu1 %v3191_v23 }
  0xa9   : > { %479 = vmatmul.mubr.f32.gmra.mrb[14].mxu0 %v282_v24  ;;  %611 = vmatmul.mubr.f32.gmra.mrb[14].mxu1 %v3967_v25 }
  0xaa   : > { %484 = vmatprep.mubr.f32.mxu0 %v3674_v0  ;;  %616 = vmatprep.mubr.f32.mxu1 %v3674_v0 }
  0xab   : > { %3194 = vmatpush3.bf16.msra.mxu1 %v3191_v23 }
  0xad   : > { %485 = vmatmul.mubr.f32.gmra.mrb[16].mxu0 %v283_v26  ;;  %617 = vmatmul.mubr.f32.gmra.mrb[16].mxu1 %v3974_v27 }
  0xae   : > { %490 = vmatprep.mubr.f32.mxu0 %v3674_v0  ;;  %622 = vmatprep.mubr.f32.mxu1 %v3674_v0 }
  0xb1   : > { %491 = vmatmul.mubr.f32.gmra.mrb[18].mxu0 %v284_v28  ;;  %623 = vmatmul.mubr.f32.gmra.mrb[18].mxu1 %v3981_v29 }
  0xb2   : > { %496 = vmatprep.mubr.f32.mxu0 %v3674_v0  ;;  %2875 = vmatprep.mubr.f32.mxu1 %v3905_v54 }
  0xb5   : > { %497 = vmatmul.mubr.f32.gmra.mrb[20].mxu0 %v285_v30  ;;  %2876 = vmatmul.mubr.f32.vlgmr.msra.gmra.mrb[20].mxu1 %v3914_v59 }
  0xb6   : > { %502 = vmatprep.mubr.f32.mxu0 %v3674_v0  ;;  %2878 = vmatprep.mubr.f32.mxu1 %v3924_v1 }
  0xb9   : > { %503 = vmatmul.mubr.f32.gmra.mrb[22].mxu0 %v286_v31  ;;  %2879 = vmatmul.mubr.f32.gmra.mrb[22].mxu1 %v3934_v6 }
  0xba   : > { %508 = vmatprep.mubr.f32.mxu0 %v3674_v0  ;;  %2881 = vmatprep.mubr.f32.mxu1 %v279_v11 }
  0xbd   : > { %509 = vmatmul.mubr.f32.gmra.mrb[24].mxu0 %v287_v32  ;;  %2882 = vmatmul.mubr.f32.gmra.mrb[24].mxu1 %v280_v16 }
  0xbe   : > { %514 = vmatprep.mubr.f32.mxu0 %v3674_v0  ;;  %2884 = vmatprep.mubr.f32.mxu1 %v281_v21 }
  0xc1   : > { %515 = vmatmul.mubr.f32.gmra.mrb[26].mxu0 %v288_v33  ;;  %2885 = vmatmul.mubr.f32.gmra.mrb[26].mxu1 %v282_v24 }
  0xc2   : > { %520 = vmatprep.mubr.f32.mxu0 %v3674_v0  ;;  %2887 = vmatprep.mubr.f32.mxu1 %v283_v26 }
  0xc5   : > { %521 = vmatmul.mubr.f32.gmra.mrb[28].mxu0 %v289_v34  ;;  %2888 = vmatmul.mubr.f32.gmra.mrb[28].mxu1 %v284_v28 }
  0xc6   : > { %526 = vmatprep.mubr.f32.mxu0 %v3674_v0  ;;  %2890 = vmatprep.mubr.f32.mxu1 %v285_v30 }
  0xc9   : > { %527 = vmatmul.mubr.f32.gmra.mrb[30].mxu0 %v290_v35  ;;  %2891 = vmatmul.mubr.f32.gmra.mrb[30].mxu1 %v286_v31 }
  0xca   : > { %532 = vmatprep.mubr.f32.mxu0 %v3674_v0  ;;  %2893 = vmatprep.mubr.f32.mxu1 %v287_v32 }
  0xcd   : > { %533 = vmatmul.mubr.f32.gmra.mrb[32].mxu0 %v291_v36  ;;  %2894 = vmatmul.mubr.f32.gmra.mrb[32].mxu1 %v288_v33 }
  0xce   : > { %538 = vmatprep.mubr.f32.mxu0 %v3674_v0  ;;  %2896 = vmatprep.mubr.f32.mxu1 %v289_v34 }
  0xd1   : > { %539 = vmatmul.mubr.f32.gmra.mrb[34].mxu0 %v292_v37  ;;  %2897 = vmatmul.mubr.f32.gmra.mrb[34].mxu1 %v290_v35 }
  0xd2   : > { %544 = vmatprep.mubr.f32.mxu0 %v3674_v0  ;;  %2899 = vmatprep.mubr.f32.mxu1 %v291_v36 }
  0xd5   : > { %545 = vmatmul.mubr.f32.gmra.mrb[36].mxu0 %v293_v38  ;;  %2900 = vmatmul.mubr.f32.gmra.mrb[36].mxu1 %v292_v37 }
  0xd6   : > { %550 = vmatprep.mubr.f32.mxu0 %v3674_v0  ;;  %2902 = vmatprep.mubr.f32.mxu1 %v293_v38 }
  0xd9   : > { %551 = vmatmul.mubr.f32.gmra.mrb[38].mxu0 %v294_v39  ;;  %2903 = vmatmul.mubr.f32.gmra.mrb[38].mxu1 %v294_v39 }
  0xda   : > { %556 = vmatprep.mubr.f32.mxu0 %v3674_v0  ;;  %2905 = vmatprep.mubr.f32.mxu1 %v295_v40 }
  0xdd   : > { %557 = vmatmul.mubr.f32.gmra.mrb[40].mxu0 %v295_v40  ;;  %2906 = vmatmul.mubr.f32.gmra.mrb[40].mxu1 %v296_v41 }
  0xde   : > { %562 = vmatprep.mubr.f32.mxu0 %v3674_v0  ;;  %2908 = vmatprep.mubr.f32.mxu1 %v3908_v55  ;;  %v357_v0 = vlaneseq }
  0xe0   : > { %v4022_v42 = vshrl.u32 %v357_v0, 7 }
  0xe1   : > { %563 = vmatmul.mubr.f32.gmra.mrb[42].mxu0 %v296_v41  ;;  %2909 = vmatmul.mubr.f32.gmra.mrb[42].mxu1 %v3918_v60 }
  0xe2   : > { %2911 = vmatprep.mubr.f32.mxu1 %v3928_v2  ;;  %v359_v43 = vsub.s32 0, %v4022_v42  ;;  %v363_v51 = vsub.s32 1, %v4022_v42 }
  0xe4   : > { %v4031_v45 = vrot.slane %v4028_v44, %v359_v43  ;;  %v4046_v56 = vrot.slane %v4028_v44, %v363_v51 }
  0xe5   : > { %2912 = vmatmul.mubr.f32.gmra.mrb[44].mxu1 %v3938_v7 }
  0xe6   : > { %2914 = vmatprep.mubr.f32.mxu1 %v3946_v12 }
  0xe9   : > { %2915 = vmatmul.mubr.f32.gmra.mrb[46].mxu1 %v3953_v17 }
  0xea   : > { %2917 = vmatprep.mubr.f32.mxu1 %v3960_v22 }
  0xed   : > { %2918 = vmatmul.mubr.f32.gmra.mrb[48].mxu1 %v3967_v25 }
  0xee   : > { %2920 = vmatprep.mubr.f32.mxu1 %v3974_v27 }
  0xf1   : > { %2921 = vmatmul.mubr.f32.gmra.mrb[50].mxu1 %v3981_v29 }
 0x160   : > { %v438_v46 = vpop.f32.mrb[0].mxu0  ;;  %v4033_v47 = vpop.f32.mrb[0].mxu1 }
 0x161   : > { %v439_v48 = vadd.f32 %v438_v46, %v4031_v45  ;;  %v440_v49 = vpop.f32.mrb[1].mxu0  ;;  %v4036_v50 = vpop.f32.mrb[1].mxu1  ;;  %v367_v46 = vsub.s32 2, %v4022_v42 }
 0x162   : > { %v441_v61 = vadd.f32 %v440_v49, %v4046_v56 }
 0x163   : > { %2927 = vmatprep.mubr.f32.mxu1 %v439_v48 }
 0x164   : > { %v4039_v52 = vpop.f32.mrb[2].mxu0  ;;  %v4041_v53 = vpop.f32.mrb[2].mxu1 }
 0x165   : > { %v446_v54 = vpop.f32.mrb[3].mxu0  ;;  %v4043_v55 = vpop.f32.mrb[3].mxu1 }
 0x166   : > { %v447_v5 = vadd.f32 %v446_v54, %v4046_v56 }
 0x168   : > { %v4048_v57 = vpop.f32.mrb[4].mxu0  ;;  %v4050_v58 = vpop.f32.mrb[4].mxu1 }
 0x169   : > { %v452_v59 = vpop.f32.mrb[5].mxu0  ;;  %v584_v60 = vpop.f32.mrb[5].mxu1 }
 0x16a   : > { %v453_v62 = vadd.f32 %v452_v59, %v4046_v56  ;;  %v585_v9 = vadd.f32 %v584_v60, %v4046_v56 }
 0x16c   : > { %v854_v63 = vmax.f32 %v441_v61, %v453_v62  ;;  %v4054_v1 = vpop.f32.mrb[6].mxu0  ;;  %v4056_v2 = vpop.f32.mrb[6].mxu1 }
 0x16d   : > { %v458_v3 = vpop.f32.mrb[7].mxu0  ;;  %v590_v4 = vpop.f32.mrb[7].mxu1 }
 0x16e   : > { %v459_v6 = vadd.f32 %v458_v3, %v4046_v56  ;;  %v591_v15 = vadd.f32 %v590_v4, %v4046_v56  ;;  %v4098_v3 = vrot.slane %v4028_v44, %v367_v46 }
 0x170   : > { %v856_v7 = vmax.f32 %v447_v5, %v459_v6  ;;  %v4060_v8 = vpop.f32.mrb[8].mxu0  ;;  %v4063_v10 = vpop.f32.mrb[8].mxu1 }
 0x171   : > { %v464_v11 = vpop.f32.mrb[9].mxu0  ;;  %v596_v12 = vpop.f32.mrb[9].mxu1 }
 0x172   : > { %v597_v13 = vadd.f32 %v596_v12, %v4046_v56  ;;  %v465_v26 = vadd.f32 %v464_v11, %v4046_v56 }
 0x174   : > { %v4066_v14 = vpop.f32.mrb[10].mxu0  ;;  %v866_v16 = vmax.f32 %v585_v9, %v597_v13  ;;  %v4069_v17 = vpop.f32.mrb[10].mxu1 }
 0x175   : > { %v470_v18 = vpop.f32.mrb[11].mxu0  ;;  %v602_v19 = vpop.f32.mrb[11].mxu1 }
 0x176   : > { %v603_v20 = vadd.f32 %v602_v19, %v4046_v56  ;;  %v471_v33 = vadd.f32 %v470_v18, %v4046_v56 }
 0x178   : > { %v4072_v21 = vpop.f32.mrb[12].mxu0  ;;  %v868_v22 = vmax.f32 %v591_v15, %v603_v20  ;;  %v4074_v23 = vpop.f32.mrb[12].mxu1  ;;  %v445_v15 = vadd.f32 %v4039_v52, %v4031_v45 }
 0x179   : > { %v476_v24 = vpop.f32.mrb[13].mxu0  ;;  %v608_v25 = vpop.f32.mrb[13].mxu1 }
 0x17a   : > { %v477_v27 = vadd.f32 %v476_v24, %v4046_v56  ;;  %v609_v38 = vadd.f32 %v608_v25, %v4046_v56  ;;  %v451_v24 = vadd.f32 %v4048_v57, %v4031_v45 }
 0x17c   : > { %v870_v28 = vmax.f32 %v465_v26, %v477_v27  ;;  %v4078_v29 = vpop.f32.mrb[14].mxu0  ;;  %v4080_v30 = vpop.f32.mrb[14].mxu1 }
 0x17d   : > { %v482_v31 = vpop.f32.mrb[15].mxu0  ;;  %v614_v32 = vpop.f32.mrb[15].mxu1 }
 0x17e   : > { %v886_v34 = vmax.f32 %v854_v63, %v870_v28  ;;  %v483_v35 = vadd.f32 %v482_v31, %v4046_v56  ;;  %v615_v51 = vadd.f32 %v614_v32, %v4046_v56  ;;  %v457_v32 = vadd.f32 %v4054_v1, %v4031_v45 }
 0x180   : > { %v872_v36 = vmax.f32 %v471_v33, %v483_v35  ;;  %v4084_v37 = vpop.f32.mrb[16].mxu0  ;;  %v4087_v39 = vpop.f32.mrb[16].mxu1 }
 0x181   : > { %v488_v40 = vpop.f32.mrb[17].mxu0  ;;  %v620_v41 = vpop.f32.mrb[17].mxu1 }
 0x182   : > { %v888_v0 = vmax.f32 %v856_v7, %v872_v36  ;;  %v621_v43 = vadd.f32 %v620_v41, %v4046_v56  ;;  %v4103_v9 = vadd.f32 %v488_v40, %v4046_v56  ;;  %v463_v36 = vadd.f32 %v4060_v8, %v4031_v45 }
 0x184   : > { %v3195_v48 = vpack.c.bf16 %v888_v0, %v886_v34  ;;  %v4091_v49 = vpop.f32.mrb[18].mxu0  ;;  %v882_v54 = vmax.f32 %v609_v38, %v621_v43  ;;  %v4094_v59 = vpop.f32.mrb[18].mxu1  ;;  %v469_v0 = vadd.f32 %v4066_v14, %v4031_v45  ;;  %v481_v14 = vadd.f32 %v4078_v29, %v4031_v45 }
 0x185   : > { %v494_v60 = vpop.f32.mrb[19].mxu0  ;;  %v626_v61 = vpop.f32.mrb[19].mxu1 }
 0x186   : > { %3196 = vmatprep.subr.bf16.mxu1 %v3195_v48  ;;  %v898_v62 = vmax.f32 %v866_v16, %v882_v54  ;;  %v627_v63 = vadd.f32 %v626_v61, %v4046_v56  ;;  %v495_v52 = vadd.f32 %v494_v60, %v4046_v56 }
 0x187   : > { %3198 = vmatpush3.bf16.xpose.msra.mxu1 %v3195_v48  ;;  %v475_v48 = vadd.f32 %v4072_v21, %v4031_v45 }
 0x188   : > { %v4100_v4 = vpop.f32.mrb[20].mxu0  ;;  %v884_v42 = vmax.f32 %v615_v51, %v627_v63  ;;  %v2877_v5 = vpop.f32.mrb[20].mxu1 }
 0x189   : > { %v500_v6 = vpop.f32.mrb[21].mxu0  ;;  %v695_v7 = vpop.f32.mrb[21].mxu1  ;;  %v701_v13 = vadd.f32 %v2877_v5, %v4098_v3  ;;  %v487_v5 = vadd.f32 %v4084_v37, %v4031_v45 }
 0x18a   : > { %v4106_v11 = vadd.f32 %v500_v6, %v4046_v56  ;;  %v900_v12 = vmax.f32 %v868_v22, %v884_v42  ;;  %v696_v19 = vadd.f32 %v695_v7, %v4098_v3 }
 0x18c   : > { %v858_v44 = vmax.f32 %v4103_v9, %v4106_v11  ;;  %v4113_v16 = vpop.f32.mrb[22].mxu0  ;;  %v4115_v18 = vpack.c.bf16 %v900_v12, %v898_v62  ;;  %v2880_v20 = vpop.f32.mrb[22].mxu1 }
 0x18d   : > { %v506_v25 = vpop.f32.mrb[23].mxu0  ;;  %v711_v22 = vadd.f32 %v2880_v20, %v4098_v3  ;;  %v705_v26 = vpop.f32.mrb[23].mxu1 }
 0x18e   : > { %2928 = vmatmul.mubr.f32.vlgmr.msra.gmra.mrb[52].mxu1 %v445_v15  ;;  %v507_v27 = vadd.f32 %v506_v25, %v4046_v56  ;;  %v706_v28 = vadd.f32 %v705_v26, %v4098_v3 }
 0x18f   : > { %2930 = vmatprep.mubr.f32.mxu1 %v451_v24  ;;  %v857_v31 = vmax.f32 %v701_v13, %v711_v22 }
 0x190   : > { %v860_v33 = vmax.f32 %v495_v52, %v507_v27  ;;  %v4126_v34 = vpop.f32.mrb[24].mxu0  ;;  %v855_v57 = vmax.f32 %v696_v19, %v706_v28  ;;  %v2883_v35 = vpop.f32.mrb[24].mxu1 }
 0x191   : > { %v512_v38 = vpop.f32.mrb[25].mxu0  ;;  %v715_v40 = vpop.f32.mrb[25].mxu1  ;;  %v721_v41 = vadd.f32 %v2883_v35, %v4098_v3 }
 0x192   : > { %2931 = vmatmul.mubr.f32.gmra.mrb[54].mxu1 %v457_v32  ;;  %v716_v1 = vadd.f32 %v715_v40, %v4098_v3  ;;  %v513_v9 = vadd.f32 %v512_v38, %v4046_v56 }
 0x193   : > { %2933 = vmatprep.mubr.f32.mxu1 %v463_v36 }
 0x194   : > { %v4133_v43 = vpop.f32.mrb[26].mxu0  ;;  %v2886_v46 = vpop.f32.mrb[26].mxu1 }
 0x195   : > { %v518_v51 = vpop.f32.mrb[27].mxu0  ;;  %v731_v8 = vadd.f32 %v2886_v46, %v4098_v3  ;;  %v725_v54 = vpop.f32.mrb[27].mxu1 }
 0x196   : > { %2934 = vmatmul.mubr.f32.gmra.mrb[56].mxu1 %v469_v0  ;;  %v726_v60 = vadd.f32 %v725_v54, %v4098_v3  ;;  %v519_v22 = vadd.f32 %v518_v51, %v4046_v56 }
 0x197   : > { %2936 = vmatprep.mubr.f32.mxu1 %v475_v48  ;;  %v873_v61 = vmax.f32 %v721_v41, %v731_v8 }
 0x198   : > { %v4142_v62 = vpop.f32.mrb[28].mxu0  ;;  %v871_v63 = vmax.f32 %v716_v1, %v726_v60  ;;  %v2889_v42 = vpop.f32.mrb[28].mxu1 }
 0x199   : > { %v524_v21 = vpop.f32.mrb[29].mxu0  ;;  %v4146_v6 = vmax.f32 %v857_v31, %v873_v61  ;;  %v735_v7 = vpop.f32.mrb[29].mxu1  ;;  %v741_v29 = vadd.f32 %v2889_v42, %v4098_v3 }
 0x19a   : > { %2937 = vmatmul.mubr.f32.gmra.mrb[58].mxu1 %v481_v14  ;;  %v525_v11 = vadd.f32 %v524_v21, %v4046_v56  ;;  %v4150_v12 = vmax.f32 %v855_v57, %v871_v63  ;;  %v736_v19 = vadd.f32 %v735_v7, %v4098_v3 }
 0x19b   : > { %2943 = vmatprep.mubr.f32.mxu1 %v487_v5 }
 0x19c   : > { %v874_v13 = vmax.f32 %v513_v9, %v525_v11  ;;  %v4153_v15 = vpop.f32.mrb[30].mxu0  ;;  %v2892_v37 = vpop.f32.mrb[30].mxu1 }
 0x19d   : > { %v530_v20 = vpop.f32.mrb[31].mxu0  ;;  %v751_v24 = vadd.f32 %v2892_v37, %v4098_v3  ;;  %v745_v25 = vpop.f32.mrb[31].mxu1 }
 0x19e   : > { %v890_v26 = vmax.f32 %v858_v44, %v874_v13  ;;  %v531_v52 = vadd.f32 %v530_v20, %v4046_v56  ;;  %v746_v27 = vadd.f32 %v745_v25, %v4098_v3 }
 0x19f   : > { %v861_v28 = vmax.f32 %v741_v29, %v751_v24  ;;  %v493_v29 = vadd.f32 %v4091_v49, %v4031_v45  ;;  %v499_v24 = vadd.f32 %v4100_v4, %v4031_v45 }
 0x1a0   : > { %v876_v31 = vmax.f32 %v519_v22, %v531_v52  ;;  %v4160_v32 = vpop.f32.mrb[32].mxu0  ;;  %v859_v57 = vmax.f32 %v736_v19, %v746_v27  ;;  %v2895_v35 = vpop.f32.mrb[32].mxu1 }
 0x1a1   : > { %v536_v36 = vpop.f32.mrb[33].mxu0  ;;  %v755_v38 = vpop.f32.mrb[33].mxu1  ;;  %v761_v41 = vadd.f32 %v2895_v35, %v4098_v3 }
 0x1a2   : > { %v892_v40 = vmax.f32 %v860_v33, %v876_v31  ;;  %v756_v44 = vadd.f32 %v755_v38, %v4098_v3  ;;  %v537_v21 = vadd.f32 %v536_v36, %v4046_v56  ;;  %v505_v31 = vadd.f32 %v4113_v16, %v4031_v45 }
 0x1a3   : > { %v511_v38 = vadd.f32 %v4126_v34, %v4031_v45  ;;  %v517_v16 = vadd.f32 %v4133_v43, %v4031_v45  ;;  %v523_v34 = vadd.f32 %v4142_v62, %v4031_v45 }
 0x1a4   : > { %v3199_v0 = vpack.c.bf16 %v892_v40, %v890_v26  ;;  %v4163_v1 = vpop.f32.mrb[34].mxu0  ;;  %v2898_v46 = vpop.f32.mrb[34].mxu1 }
 0x1a5   : > { %v542_v48 = vpop.f32.mrb[35].mxu0  ;;  %v771_v51 = vadd.f32 %v2898_v46, %v4098_v3  ;;  %v765_v8 = vpop.f32.mrb[35].mxu1 }
 0x1a6   : > { %3200 = vmatprep.subr.bf16.mxu1 %v3199_v0  ;;  %v766_v54 = vadd.f32 %v765_v8, %v4098_v3  ;;  %v543_v52 = vadd.f32 %v542_v48, %v4046_v56 }
 0x1a7   : > { %3202 = vmatpush3.bf16.xpose.msra.mxu1 %v3199_v0  ;;  %v877_v60 = vmax.f32 %v761_v41, %v771_v51  ;;  %v573_v0 = vadd.f32 %v4036_v50, %v4046_v56 }
 0x1a8   : > { %v4168_v61 = vpop.f32.mrb[36].mxu0  ;;  %v875_v33 = vmax.f32 %v756_v44, %v766_v54  ;;  %v2901_v14 = vpop.f32.mrb[36].mxu1 }
 0x1a9   : > { %v548_v63 = vpop.f32.mrb[37].mxu0  ;;  %v4170_v42 = vmax.f32 %v861_v28, %v877_v60  ;;  %v775_v5 = vpop.f32.mrb[37].mxu1  ;;  %v781_v11 = vadd.f32 %v2901_v14, %v4098_v3  ;;  %v579_v14 = vadd.f32 %v4043_v55, %v4046_v56 }
 0x1aa   : > { %v549_v7 = vadd.f32 %v548_v63, %v4046_v56  ;;  %v4174_v9 = vmax.f32 %v859_v57, %v875_v33  ;;  %v776_v37 = vadd.f32 %v775_v5, %v4098_v3 }
 0x1ac   : > { %v862_v13 = vmax.f32 %v537_v21, %v549_v7  ;;  %v4179_v19 = vpop.f32.mrb[38].mxu0  ;;  %v2904_v20 = vpop.f32.mrb[38].mxu1  ;;  %v529_v7 = vadd.f32 %v4153_v15, %v4031_v45  ;;  %v3211_v15 = vpack.c.bf16 %v4146_v6, %v4150_v12  ;;  %v541_v6 = vadd.f32 %v4163_v1, %v4031_v45 }
 0x1ad   : > { %v554_v25 = vpop.f32.mrb[39].mxu0  ;;  %v791_v22 = vadd.f32 %v2904_v20, %v4098_v3  ;;  %v785_v26 = vpop.f32.mrb[39].mxu1 }
 0x1ae   : > { %2944 = vmatmul.mubr.f32.vlgmr.msra.gmra.mrb[60].mxu1 %v493_v29  ;;  %v555_v27 = vadd.f32 %v554_v25, %v4046_v56  ;;  %v786_v49 = vadd.f32 %v785_v26, %v4098_v3  ;;  %3212 = vmatprep.subr.bf16.mxu0 %v3211_v15 }
 0x1af   : > { %2946 = vmatprep.mubr.f32.mxu1 %v499_v24  ;;  %v865_v28 = vmax.f32 %v781_v11, %v791_v22  ;;  %3214 = vmatpush3.bf16.msra.mxu0 %v3211_v15 }
 0x1b0   : > { %v864_v57 = vmax.f32 %v543_v52, %v555_v27  ;;  %v4190_v35 = vpop.f32.mrb[40].mxu0  ;;  %v863_v4 = vmax.f32 %v776_v37, %v786_v49  ;;  %v2907_v36 = vpop.f32.mrb[40].mxu1  ;;  %v535_v37 = vadd.f32 %v4160_v32, %v4031_v45 }
 0x1b1   : > { %v560_v40 = vpop.f32.mrb[41].mxu0  ;;  %v795_v41 = vpop.f32.mrb[41].mxu1  ;;  %v801_v46 = vadd.f32 %v2907_v36, %v4098_v3 }
 0x1b2   : > { %2947 = vmatmul.mubr.f32.gmra.mrb[62].mxu1 %v505_v31  ;;  %v561_v44 = vadd.f32 %v560_v40, %v4046_v56  ;;  %v796_v8 = vadd.f32 %v795_v41, %v4098_v3 }
 0x1b3   : > { %2949 = vmatprep.mubr.f32.mxu1 %v511_v38  ;;  %v547_v38 = vadd.f32 %v4168_v61, %v4031_v45 }
 0x1b4   : > { %v878_v48 = vmax.f32 %v561_v44, %v573_v0  ;;  %v564_v51 = vpop.f32.mrb[42].mxu0  ;;  %v2910_v54 = vpop.f32.mrb[42].mxu1 }
 0x1b5   : > { %v566_v60 = vpop.f32.mrb[43].mxu0  ;;  %v811_v50 = vadd.f32 %v2910_v54, %v4098_v3  ;;  %v805_v33 = vpop.f32.mrb[43].mxu1 }
 0x1b6   : > { %v894_v63 = vmax.f32 %v862_v13, %v878_v48  ;;  %v567_v5 = vadd.f32 %v566_v60, %v4046_v56  ;;  %2950 = vmatmul.mubr.f32.gmra.mrb[64].mxu1 %v517_v16  ;;  %v806_v43 = vadd.f32 %v805_v33, %v4098_v3  ;;  %v559_v16 = vadd.f32 %v4190_v35, %v4031_v45 }
 0x1b7   : > { %2952 = vmatprep.mubr.f32.mxu1 %v523_v34  ;;  %v881_v21 = vmax.f32 %v801_v46, %v811_v50  ;;  %v553_v46 = vadd.f32 %v4179_v19, %v4031_v45  ;;  %v577_v19 = vadd.f32 %v4041_v53, %v4031_v45  ;;  %v583_v35 = vadd.f32 %v4050_v58, %v4031_v45 }
 0x1b8   : > { %v880_v11 = vmax.f32 %v567_v5, %v579_v14  ;;  %v879_v62 = vmax.f32 %v796_v8, %v806_v43  ;;  %v2913_v29 = vpop.f32.mrb[44].mxu1  ;;  %v565_v8 = vadd.f32 %v564_v51, %v4031_v45  ;;  %v589_v51 = vadd.f32 %v4056_v2, %v4031_v45 }
 0x1b9   : > { %v4212_v20 = vmax.f32 %v865_v28, %v881_v21  ;;  %v815_v55 = vpop.f32.mrb[45].mxu1  ;;  %v821_v24 = vadd.f32 %v2913_v29, %v4098_v3  ;;  %v607_v53 = vadd.f32 %v4074_v23, %v4031_v45  ;;  %v613_v58 = vadd.f32 %v4080_v30, %v4031_v45 }
 0x1ba   : > { %v896_v13 = vmax.f32 %v864_v57, %v880_v11  ;;  %2953 = vmatmul.mubr.f32.gmra.mrb[66].mxu1 %v529_v7  ;;  %v895_v56 = vmax.f32 %v863_v4, %v879_v62  ;;  %v816_v22 = vadd.f32 %v815_v55, %v4098_v3  ;;  %v619_v2 = vadd.f32 %v4087_v39, %v4031_v45 }
 0x1bb   : > { %2959 = vmatprep.mubr.f32.mxu1 %v535_v37 }
 0x1bc   : > { %v3203_v25 = vpack.c.bf16 %v896_v13, %v894_v63  ;;  %v2916_v26 = vpop.f32.mrb[46].mxu1 }
 0x1bd   : > { %v831_v52 = vadd.f32 %v2916_v26, %v4098_v3  ;;  %v825_v27 = vpop.f32.mrb[47].mxu1 }
 0x1be   : > { %3204 = vmatprep.subr.bf16.mxu1 %v3203_v25  ;;  %v826_v32 = vadd.f32 %v825_v27, %v4098_v3 }
 0x1bf   : > { %3206 = vmatpush3.bf16.xpose.msra.mxu1 %v3203_v25  ;;  %v869_v49 = vmax.f32 %v821_v24, %v831_v52 }
 0x1c0   : > { %3208 = vmatprep.subr.bf16.mxu1 %v4115_v18  ;;  %v867_v28 = vmax.f32 %v816_v22, %v826_v32  ;;  %v2919_v31 = vpop.f32.mrb[48].mxu1 }
 0x1c1   : > { %v835_v57 = vpop.f32.mrb[49].mxu1  ;;  %v841_v4 = vadd.f32 %v2919_v31, %v4098_v3 }
 0x1c2   : > { %v836_v12 = vadd.f32 %v835_v57, %v4098_v3 }
 0x1c4   : > { %v2922_v36 = vpop.f32.mrb[50].mxu1 }
 0x1c5   : > { %v851_v40 = vadd.f32 %v2922_v36, %v4098_v3  ;;  %v845_v41 = vpop.f32.mrb[51].mxu1 }
 0x1c6   : > { %2960 = vmatmul.mubr.f32.vlgmr.msra.gmra.mrb[68].mxu1 %v541_v6  ;;  %v846_v0 = vadd.f32 %v845_v41, %v4098_v3  ;;  %v3215_v3 = vpack.c.bf16 %v4170_v42, %v4174_v9  ;;  %v595_v42 = vadd.f32 %v4063_v10, %v4031_v45  ;;  %v4256_v9 = vpack.c.bf16 %v4212_v20, %v895_v56 }
 0x1c7   : > { %2962 = vmatprep.mubr.f32.mxu1 %v547_v38  ;;  %3210 = vmatpush3.bf16.xpose.msra.mxu1 %v4115_v18  ;;  %v885_v44 = vmax.f32 %v841_v4, %v851_v40  ;;  %v571_v18 = vadd.f32 %v4033_v47, %v4031_v45  ;;  %v601_v47 = vadd.f32 %v4069_v17, %v4031_v45 }
 0x1c8   : > { %v883_v1 = vmax.f32 %v836_v12, %v846_v0  ;;  %3216 = vmatprep.subr.bf16.mxu1 %v3215_v3  ;;  %3220 = vmatprep.subr.bf16.mxu0 %v4256_v9  ;;  %v625_v10 = vadd.f32 %v4094_v59, %v4031_v45 }
 0x1c9   : > { %v901_v48 = vmax.f32 %v869_v49, %v885_v44 }
 0x1ca   : > { %2963 = vmatmul.mubr.f32.gmra.mrb[70].mxu1 %v553_v46  ;;  %v899_v61 = vmax.f32 %v867_v28, %v883_v1 }
 0x1cb   : > { %2965 = vmatprep.mubr.f32.mxu1 %v559_v16 }
 0x1cc   : > { %v4261_v17 = vpack.c.bf16 %v901_v48, %v899_v61 }
 0x1ce   : > { %2966 = vmatmul.mubr.f32.gmra.mrb[72].mxu1 %v565_v8 }
 0x1cf   : > { %2968 = vmatprep.mubr.f32.mxu1 %v571_v18 }
 0x1d2   : > { %2969 = vmatmul.mubr.f32.gmra.mrb[74].mxu1 %v577_v19 }
 0x1d3   : > { %2975 = vmatprep.mubr.f32.mxu1 %v583_v35 }
 0x1d6   : > { %2976 = vmatmul.mubr.f32.vlgmr.msra.gmra.mrb[76].mxu1 %v589_v51 }
 0x1d7   : > { %2978 = vmatprep.mubr.f32.mxu1 %v595_v42  ;;  %3218 = vmatpush3.bf16.msra.mxu1 %v3215_v3 }
 0x1d8   : > { %3224 = vmatprep.subr.bf16.mxu1 %v4261_v17 }
 0x1da   : > { %2979 = vmatmul.mubr.f32.gmra.mrb[78].mxu1 %v601_v47 }
 0x1db   : > { %2981 = vmatprep.mubr.f32.mxu1 %v607_v53 }
 0x1de   : > { %2982 = vmatmul.mubr.f32.gmra.mrb[80].mxu1 %v613_v58 }
 0x1df   : > { %2984 = vmatprep.mubr.f32.mxu1 %v619_v2 }
 0x1e2   : > { %2985 = vmatmul.mubr.f32.gmra.mrb[82].mxu1 %v625_v10 }
 0x261   : > { %v4264_v23 = vpop.f32.mrb[52].mxu1 }
 0x262   : > { %v4266_v30 = vpop.f32.mrb[53].mxu1  ;;  %v1326_v45 = vsel %vm1322_vm0, %v4264_v23, -inf }
 0x263   : > { %v1323_v39 = vsel %vm1322_vm0, %v4266_v30, -inf }
 0x264   : > { %1324 = vmax.xlane.f32.xlu0 %v1323_v39 }
 0x265   : > { %v4270_v54 = vpop.f32.mrb[54].mxu1 }
 0x266   : > { %v4272_v34 = vpop.f32.mrb[55].mxu1  ;;  %v1332_v33 = vsel %vm1322_vm0, %v4270_v54, -inf }
 0x267   : > { %v1329_v59 = vsel %vm1322_vm0, %v4272_v34, -inf }
 0x268   : > { %1327 = vmax.xlane.f32.xlu0 %v1326_v45  ;;  %1330 = vmax.xlane.f32.xlu1 %v1329_v59 }
 0x269   : > { %v4278_v60 = vpop.f32.mrb[56].mxu1 }
 0x26a   : > { %v4280_v50 = vpop.f32.mrb[57].mxu1  ;;  %v1338_v43 = vsel %vm1322_vm0, %v4278_v60, -inf }
 0x26b   : > { %v1335_v14 = vsel %vm1322_vm0, %v4280_v50, -inf }
 0x26c   : > { %1333 = vmax.xlane.f32.xlu1 %v1332_v33  ;;  %1336 = vmax.xlane.f32.xlu0 %v1335_v14 }
 0x26d   : > { %v4286_v63 = vpop.f32.mrb[58].mxu1 }
 0x26e   : > { %v4288_v5 = vpop.f32.mrb[59].mxu1  ;;  %v1344_v7 = vsel %vm1322_vm0, %v4286_v63, -inf }
 0x26f   : > { %v1341_v21 = vsel %vm1322_vm0, %v4288_v5, -inf }
 0x270   : > { %1339 = vmax.xlane.f32.xlu1 %v1338_v43  ;;  %1342 = vmax.xlane.f32.xlu0 %v1341_v21 }
 0x274   : > { %1345 = vmax.xlane.f32.xlu1 %v1344_v7 }
 0x281   : > { %v4296_v11 = vpop.f32.mrb[60].mxu1 }
 0x282   : > { %v4298_v62 = vpop.f32.mrb[61].mxu1  ;;  %v1350_v29 = vsel %vm1322_vm0, %v4296_v11, -inf }
 0x283   : > { %1351 = vmax.xlane.f32.xlu1 %v1350_v29  ;;  %v1347_v37 = vsel %vm1322_vm0, %v4298_v62, -inf }
 0x284   : > { %1348 = vmax.xlane.f32.xlu0 %v1347_v37 }
 0x285   : > { %v4304_v20 = vpop.f32.mrb[62].mxu1 }
 0x286   : > { %v4306_v55 = vpop.f32.mrb[63].mxu1  ;;  %v1356_v13 = vsel %vm1322_vm0, %v4304_v20, -inf }
 0x287   : > { %1357 = vmax.xlane.f32.xlu1 %v1356_v13  ;;  %v1353_v56 = vsel %vm1322_vm0, %v4306_v55, -inf }
 0x288   : > { %1354 = vmax.xlane.f32.xlu0 %v1353_v56 }
 0x289   : > { %v4312_v24 = vpop.f32.mrb[64].mxu1 }
 0x28a   : > { %v4314_v25 = vpop.f32.mrb[65].mxu1  ;;  %v1362_v22 = vsel %vm1322_vm0, %v4312_v24, -inf }
 0x28b   : > { %1363 = vmax.xlane.f32.xlu1 %v1362_v22  ;;  %v1359_v26 = vsel %vm1322_vm0, %v4314_v25, -inf }
 0x28c   : > { %1360 = vmax.xlane.f32.xlu0 %v1359_v26 }
 0x28d   : > { %v4320_v15 = vpop.f32.mrb[66].mxu1 }
 0x28e   : > { %v4322_v52 = vpop.f32.mrb[67].mxu1  ;;  %v1368_v27 = vsel %vm1322_vm0, %v4320_v15, -inf }
 0x28f   : > { %1369 = vmax.xlane.f32.xlu1 %v1368_v27  ;;  %v1365_v32 = vsel %vm1322_vm0, %v4322_v52, -inf }
 0x290   : > { %1366 = vmax.xlane.f32.xlu0 %v1365_v32 }
 0x299   : > { %v4328_v49 = vpop.f32.mrb[68].mxu1 }
 0x29a   : > { %v4330_v28 = vpop.f32.mrb[69].mxu1  ;;  %v1374_v31 = vsel %vm1322_vm0, %v4328_v49, -inf }
 0x29b   : > { %1375 = vmax.xlane.f32.xlu1 %v1374_v31  ;;  %v1371_v57 = vsel %vm1322_vm0, %v4330_v28, -inf }
 0x29c   : > { %1372 = vmax.xlane.f32.xlu0 %v1371_v57 }
 0x29d   : > { %v4336_v4 = vpop.f32.mrb[70].mxu1 }
 0x29e   : > { %v4338_v6 = vpop.f32.mrb[71].mxu1  ;;  %v1380_v12 = vsel %vm1322_vm0, %v4336_v4, -inf }
 0x29f   : > { %1381 = vmax.xlane.f32.xlu1 %v1380_v12  ;;  %v1377_v36 = vsel %vm1322_vm0, %v4338_v6, -inf }
 0x2a0   : > { %1378 = vmax.xlane.f32.xlu0 %v1377_v36 }
 0x2a1   : > { %v4344_v38 = vpop.f32.mrb[72].mxu1 }
 0x2a2   : > { %v4346_v40 = vpop.f32.mrb[73].mxu1  ;;  %v1386_v41 = vsel %vm1322_vm0, %v4344_v38, -inf }
 0x2a3   : > { %1387 = vmax.xlane.f32.xlu1 %v1386_v41  ;;  %v1383_v0 = vsel %vm1322_vm0, %v4346_v40, -inf }
 0x2a4   : > { %1384 = vmax.xlane.f32.xlu0 %v1383_v0 }
 0x2a5   : > { %v4352_v44 = vpop.f32.mrb[74].mxu1 }
 0x2a6   : > { %v4354_v46 = vpop.f32.mrb[75].mxu1  ;;  %v1392_v1 = vsel %vm1322_vm0, %v4352_v44, -inf }
 0x2a7   : > { %1393 = vmax.xlane.f32.xlu1 %v1392_v1  ;;  %v1389_v16 = vsel %vm1322_vm0, %v4354_v46, -inf }
 0x2a8   : > { %1390 = vmax.xlane.f32.xlu0 %v1389_v16 }
 0x2a9   : > { %v4360_v48 = vpop.f32.mrb[76].mxu1 }
 0x2aa   : > { %v4362_v61 = vpop.f32.mrb[77].mxu1  ;;  %v1398_v8 = vsel %vm1322_vm0, %v4360_v48, -inf }
 0x2ab   : > { %1399 = vmax.xlane.f32.xlu1 %v1398_v8  ;;  %v1395_v3 = vsel %vm1322_vm0, %v4362_v61, -inf }
 0x2ac   : > { %1396 = vmax.xlane.f32.xlu0 %v1395_v3 }
 0x2ad   : > { %v4368_v18 = vpop.f32.mrb[78].mxu1 }
 0x2ae   : > { %v4370_v19 = vpop.f32.mrb[79].mxu1  ;;  %v1404_v35 = vsel %vm1322_vm0, %v4368_v18, -inf }
 0x2af   : > { %1405 = vmax.xlane.f32.xlu1 %v1404_v35  ;;  %v1401_v51 = vsel %vm1322_vm0, %v4370_v19, -inf }
 0x2b0   : > { %1402 = vmax.xlane.f32.xlu0 %v1401_v51 }
 0x2b1   : > { %v4376_v42 = vpop.f32.mrb[80].mxu1 }
 0x2b2   : > { %v4378_v47 = vpop.f32.mrb[81].mxu1  ;;  %v1410_v53 = vsel %vm1322_vm0, %v4376_v42, -inf }
 0x2b3   : > { %1411 = vmax.xlane.f32.xlu1 %v1410_v53  ;;  %v1407_v58 = vsel %vm1322_vm0, %v4378_v47, -inf }
 0x2b4   : > { %1408 = vmax.xlane.f32.xlu0 %v1407_v58 }
 0x2b5   : > { %v4384_v2 = vpop.f32.mrb[82].mxu1 }
 0x2b6   : > { %v4386_v10 = vpop.f32.mrb[83].mxu1  ;;  %v1416_v39 = vsel %vm1322_vm0, %v4384_v2, -inf }
 0x2b7   : > { %1417 = vmax.xlane.f32.xlu1 %v1416_v39  ;;  %v1413_v45 = vsel %vm1322_vm0, %v4386_v10, -inf }
 0x2b8   : > { %1414 = vmax.xlane.f32.xlu0 %v1413_v45 }
 0x2f1   : > { %v1325_v59 = vpop.xlane.xlu0 %1324 }
 0x2f2   : > { %v1419_v33 = vsub.f32 %v4266_v30, %v1325_v59 }
 0x2f4   : > { %v1451_v14 = vmul.f32 1.442695, %v1419_v33 }
 0x2f5   : > { %v1328_v43 = vpop.xlane.xlu0 %1327  ;;  %v1331_v21 = vpop.xlane.xlu1 %1330 }
 0x2f6   : > { %3349 = vpow2.f32 %v1451_v14  ;;  %v1420_v7 = vsub.f32 %v4264_v23, %v1328_v43  ;;  %v1421_v29 = vsub.f32 %v4272_v34, %v1331_v21 }
 0x2f8   : > { %v1453_v37 = vmul.f32 1.442695, %v1420_v7  ;;  %v1455_v13 = vmul.f32 1.442695, %v1421_v29 }
 0x2f9   : > { %v1334_v56 = vpop.xlane.xlu1 %1333  ;;  %v1337_v22 = vpop.xlane.xlu0 %1336 }
 0x2fa   : > { %3351 = vpow2.f32 %v1453_v37  ;;  %v1422_v26 = vsub.f32 %v4270_v54, %v1334_v56  ;;  %v1423_v27 = vsub.f32 %v4280_v50, %v1337_v22 }
 0x2fb   : > { %3353 = vpow2.f32 %v1455_v13 }
 0x2fc   : > { %v1457_v32 = vmul.f32 1.442695, %v1422_v26  ;;  %v1459_v30 = vmul.f32 1.442695, %v1423_v27 }
 0x2fd   : > { %v1340_v31 = vpop.xlane.xlu1 %1339  ;;  %v1343_v57 = vpop.xlane.xlu0 %1342 }
 0x2fe   : > { %3355 = vpow2.f32 %v1457_v32  ;;  %v1424_v12 = vsub.f32 %v4278_v60, %v1340_v31  ;;  %v1425_v23 = vsub.f32 %v4288_v5, %v1343_v57 }
 0x2ff   : > { %3357 = vpow2.f32 %v1459_v30 }
 0x300   : > { %v4399_v34 = vpop.eup %3349  ;;  %v1461_v36 = vmul.f32 1.442695, %v1424_v12  ;;  %v1463_v41 = vmul.f32 1.442695, %v1425_v23 }
 0x301   : > { %v1346_v0 = vpop.xlane.xlu1 %1345  ;;  %v1515_v54 = vsel %vm1322_vm0, %v4399_v34, 0.0 }
 0x302   : > { %3359 = vpow2.f32 %v1461_v36  ;;  %v1426_v50 = vsub.f32 %v4286_v63, %v1346_v0  ;;  %1516 = vadd.xlane.f32.xlu0 %v1515_v54 }
 0x303   : > { %3361 = vpow2.f32 %v1463_v41 }
 0x304   : > { %v4404_v1 = vpop.eup %3351  ;;  %v1465_v16 = vmul.f32 1.442695, %v1426_v50 }
 0x305   : > { %v4406_v60 = vpop.eup %3353  ;;  %v1518_v5 = vsel %vm1322_vm0, %v4404_v1, 0.0 }
 0x306   : > { %3363 = vpow2.f32 %v1465_v16  ;;  %1519 = vadd.xlane.f32.xlu1 %v1518_v5  ;;  %v1521_v8 = vsel %vm1322_vm0, %v4406_v60, 0.0 }
 0x307   : > { %1522 = vadd.xlane.f32.xlu0 %v1521_v8 }
 0x308   : > { %v4412_v3 = vpop.eup %3355 }
 0x309   : > { %v4414_v35 = vpop.eup %3357  ;;  %v1524_v63 = vsel %vm1322_vm0, %v4412_v3, 0.0 }
 0x30a   : > { %1525 = vadd.xlane.f32.xlu1 %v1524_v63  ;;  %v1527_v51 = vsel %vm1322_vm0, %v4414_v35, 0.0 }
 0x30b   : > { %1528 = vadd.xlane.f32.xlu0 %v1527_v51 }
 0x30c   : > { %v4420_v53 = vpop.eup %3359 }
 0x30d   : > { %v4422_v58 = vpop.eup %3361  ;;  %v1530_v39 = vsel %vm1322_vm0, %v4420_v53, 0.0 }
 0x30e   : > { %1531 = vadd.xlane.f32.xlu1 %v1530_v39  ;;  %v1533_v45 = vsel %vm1322_vm0, %v4422_v58, 0.0 }
 0x30f   : > { %1534 = vadd.xlane.f32.xlu0 %v1533_v45 }
 0x310   : > { %v4428_v59 = vpop.eup %3363  ;;  %v1352_v33 = vpop.xlane.xlu1 %1351 }
 0x311   : > { %v1428_v14 = vsub.f32 %v4296_v11, %v1352_v33  ;;  %v1349_v43 = vpop.xlane.xlu0 %1348  ;;  %v1536_v21 = vsel %vm1322_vm0, %v4428_v59, 0.0 }
 0x312   : > { %v1427_v7 = vsub.f32 %v4298_v62, %v1349_v43  ;;  %1537 = vadd.xlane.f32.xlu1 %v1536_v21 }
 0x313   : > { %v1469_v29 = vmul.f32 1.442695, %v1428_v14 }
 0x314   : > { %v1467_v37 = vmul.f32 1.442695, %v1427_v7  ;;  %v1358_v13 = vpop.xlane.xlu1 %1357 }
 0x315   : > { %3365 = vpow2.f32 %v1469_v29  ;;  %v1430_v56 = vsub.f32 %v4304_v20, %v1358_v13  ;;  %v1355_v22 = vpop.xlane.xlu0 %1354 }
 0x316   : > { %3367 = vpow2.f32 %v1467_v37  ;;  %v1429_v26 = vsub.f32 %v4306_v55, %v1355_v22 }
 0x317   : > { %v1473_v27 = vmul.f32 1.442695, %v1430_v56 }
 0x318   : > { %v1471_v32 = vmul.f32 1.442695, %v1429_v26  ;;  %v1364_v11 = vpop.xlane.xlu1 %1363 }
 0x319   : > { %3369 = vpow2.f32 %v1473_v27  ;;  %v1432_v30 = vsub.f32 %v4312_v24, %v1364_v11  ;;  %v1361_v31 = vpop.xlane.xlu0 %1360 }
 0x31a   : > { %3371 = vpow2.f32 %v1471_v32  ;;  %v1431_v62 = vsub.f32 %v4314_v25, %v1361_v31 }
 0x31b   : > { %v1477_v57 = vmul.f32 1.442695, %v1432_v30 }
 0x31c   : > { %v1475_v12 = vmul.f32 1.442695, %v1431_v62  ;;  %v1370_v23 = vpop.xlane.xlu1 %1369 }
 0x31d   : > { %3373 = vpow2.f32 %v1477_v57  ;;  %v1434_v20 = vsub.f32 %v4320_v15, %v1370_v23  ;;  %v1367_v36 = vpop.xlane.xlu0 %1366 }
 0x31e   : > { %3375 = vpow2.f32 %v1475_v12  ;;  %v1433_v55 = vsub.f32 %v4322_v52, %v1367_v36 }
 0x31f   : > { %v4440_v41 = vpop.eup %3365  ;;  %v1481_v0 = vmul.f32 1.442695, %v1434_v20 }
 0x320   : > { %v4442_v54 = vpop.eup %3367  ;;  %v1479_v24 = vmul.f32 1.442695, %v1433_v55  ;;  %v1542_v50 = vsel %vm1322_vm0, %v4440_v41, 0.0 }
 0x321   : > { %3377 = vpow2.f32 %v1481_v0  ;;  %1543 = vadd.xlane.f32.xlu1 %v1542_v50  ;;  %v1539_v25 = vsel %vm1322_vm0, %v4442_v54, 0.0 }
 0x322   : > { %3379 = vpow2.f32 %v1479_v24  ;;  %1540 = vadd.xlane.f32.xlu0 %v1539_v25 }
 0x323   : > { %v4448_v15 = vpop.eup %3369 }
 0x324   : > { %v4450_v16 = vpop.eup %3371  ;;  %v1548_v52 = vsel %vm1322_vm0, %v4448_v15, 0.0 }
 0x325   : > { %1549 = vadd.xlane.f32.xlu1 %v1548_v52  ;;  %v1545_v5 = vsel %vm1322_vm0, %v4450_v16, 0.0 }
 0x326   : > { %1546 = vadd.xlane.f32.xlu0 %v1545_v5 }
 0x327   : > { %v4456_v8 = vpop.eup %3373 }
 0x328   : > { %v4458_v63 = vpop.eup %3375  ;;  %v1376_v51 = vpop.xlane.xlu1 %1375  ;;  %v1554_v39 = vsel %vm1322_vm0, %v4456_v8, 0.0 }
 0x329   : > { %v1436_v45 = vsub.f32 %v4328_v49, %v1376_v51  ;;  %v1373_v33 = vpop.xlane.xlu0 %1372  ;;  %1555 = vadd.xlane.f32.xlu1 %v1554_v39  ;;  %v1551_v14 = vsel %vm1322_vm0, %v4458_v63, 0.0 }
 0x32a   : > { %v1435_v43 = vsub.f32 %v4330_v28, %v1373_v33  ;;  %1552 = vadd.xlane.f32.xlu0 %v1551_v14 }
 0x32b   : > { %v4466_v21 = vpop.eup %3377  ;;  %v1485_v7 = vmul.f32 1.442695, %v1436_v45 }
 0x32c   : > { %v4468_v29 = vpop.eup %3379  ;;  %v1483_v37 = vmul.f32 1.442695, %v1435_v43  ;;  %v1382_v13 = vpop.xlane.xlu1 %1381  ;;  %v1560_v56 = vsel %vm1322_vm0, %v4466_v21, 0.0 }
 0x32d   : > { %3381 = vpow2.f32 %v1485_v7  ;;  %v1438_v49 = vsub.f32 %v4336_v4, %v1382_v13  ;;  %v1379_v22 = vpop.xlane.xlu0 %1378  ;;  %1561 = vadd.xlane.f32.xlu1 %v1560_v56  ;;  %v1557_v26 = vsel %vm1322_vm0, %v4468_v29, 0.0 }
 0x32e   : > { %3383 = vpow2.f32 %v1483_v37  ;;  %v1437_v28 = vsub.f32 %v4338_v6, %v1379_v22  ;;  %1558 = vadd.xlane.f32.xlu0 %v1557_v26 }
 0x32f   : > { %v1489_v27 = vmul.f32 1.442695, %v1438_v49 }
 0x330   : > { %v1487_v32 = vmul.f32 1.442695, %v1437_v28  ;;  %v1388_v11 = vpop.xlane.xlu1 %1387 }
 0x331   : > { %3385 = vpow2.f32 %v1489_v27  ;;  %v1440_v30 = vsub.f32 %v4344_v38, %v1388_v11  ;;  %v1385_v31 = vpop.xlane.xlu0 %1384 }
 0x332   : > { %3387 = vpow2.f32 %v1487_v32  ;;  %v1439_v62 = vsub.f32 %v4346_v40, %v1385_v31 }
 0x333   : > { %v1493_v4 = vmul.f32 1.442695, %v1440_v30 }
 0x334   : > { %v1491_v57 = vmul.f32 1.442695, %v1439_v62  ;;  %v1394_v12 = vpop.xlane.xlu1 %1393 }
 0x335   : > { %3389 = vpow2.f32 %v1493_v4  ;;  %v1442_v23 = vsub.f32 %v4352_v44, %v1394_v12  ;;  %v1391_v20 = vpop.xlane.xlu0 %1390 }
 0x336   : > { %3391 = vpow2.f32 %v1491_v57  ;;  %v1441_v6 = vsub.f32 %v4354_v46, %v1391_v20 }
 0x337   : > { %v4480_v36 = vpop.eup %3381  ;;  %v1497_v55 = vmul.f32 1.442695, %v1442_v23 }
 0x338   : > { %v4482_v0 = vpop.eup %3383  ;;  %v1495_v38 = vmul.f32 1.442695, %v1441_v6  ;;  %v1400_v24 = vpop.xlane.xlu1 %1399  ;;  %v1566_v40 = vsel %vm1322_vm0, %v4480_v36, 0.0 }
 0x339   : > { %3393 = vpow2.f32 %v1497_v55  ;;  %v1444_v50 = vsub.f32 %v4360_v48, %v1400_v24  ;;  %v1397_v25 = vpop.xlane.xlu0 %1396  ;;  %1567 = vadd.xlane.f32.xlu1 %v1566_v40  ;;  %v1563_v44 = vsel %vm1322_vm0, %v4482_v0, 0.0 }
 0x33a   : > { %3395 = vpow2.f32 %v1495_v38  ;;  %v1443_v46 = vsub.f32 %v4362_v61, %v1397_v25  ;;  %1564 = vadd.xlane.f32.xlu0 %v1563_v44 }
 0x33b   : > { %v4490_v52 = vpop.eup %3385  ;;  %v1501_v5 = vmul.f32 1.442695, %v1444_v50 }
 0x33c   : > { %v4492_v51 = vpop.eup %3387  ;;  %v1499_v39 = vmul.f32 1.442695, %v1443_v46  ;;  %v1406_v45 = vpop.xlane.xlu1 %1405  ;;  %v1572_v33 = vsel %vm1322_vm0, %v4490_v52, 0.0 }
 0x33d   : > { %3397 = vpow2.f32 %v1501_v5  ;;  %v1446_v48 = vsub.f32 %v4368_v18, %v1406_v45  ;;  %v1403_v14 = vpop.xlane.xlu0 %1402  ;;  %1573 = vadd.xlane.f32.xlu1 %v1572_v33  ;;  %v1569_v43 = vsel %vm1322_vm0, %v4492_v51, 0.0 }
 0x33e   : > { %3399 = vpow2.f32 %v1499_v39  ;;  %v1445_v61 = vsub.f32 %v4370_v19, %v1403_v14  ;;  %1570 = vadd.xlane.f32.xlu0 %v1569_v43 }
 0x33f   : > { %v4500_v7 = vpop.eup %3389  ;;  %v1505_v37 = vmul.f32 1.442695, %v1446_v48 }
 0x340   : > { %v4502_v13 = vpop.eup %3391  ;;  %v1503_v56 = vmul.f32 1.442695, %v1445_v61  ;;  %v1412_v49 = vpop.xlane.xlu1 %1411  ;;  %v1578_v22 = vsel %vm1322_vm0, %v4500_v7, 0.0 }
 0x341   : > { %3401 = vpow2.f32 %v1505_v37  ;;  %v1448_v18 = vsub.f32 %v4376_v42, %v1412_v49  ;;  %v1409_v26 = vpop.xlane.xlu0 %1408  ;;  %1579 = vadd.xlane.f32.xlu1 %v1578_v22  ;;  %v1575_v28 = vsel %vm1322_vm0, %v4502_v13, 0.0 }
 0x342   : > { %3403 = vpow2.f32 %v1503_v56  ;;  %v1447_v19 = vsub.f32 %v4378_v47, %v1409_v26  ;;  %1576 = vadd.xlane.f32.xlu0 %v1575_v28  ;;  %v2191_v26 = vld [vmem:[#allocation7] sm:$0xff]  ;;  %v2192_v28 = vld [vmem:[#allocation7 + $0x8] sm:$0xff] }
 0x343   : > { %v4510_v27 = vpop.eup %3393  ;;  %v1509_v32 = vmul.f32 1.442695, %v1448_v18 }
 0x344   : > { %v4512_v11 = vpop.eup %3395  ;;  %v1507_v30 = vmul.f32 1.442695, %v1447_v19  ;;  %v1418_v31 = vpop.xlane.xlu1 %1417  ;;  %v1584_v62 = vsel %vm1322_vm0, %v4510_v27, 0.0 }
 0x345   : > { %3405 = vpow2.f32 %v1509_v32  ;;  %v1450_v42 = vsub.f32 %v4384_v2, %v1418_v31  ;;  %1585 = vadd.xlane.f32.xlu1 %v1584_v62  ;;  %v1415_v4 = vpop.xlane.xlu0 %1414  ;;  %v1581_v57 = vsel %vm1322_vm0, %v4512_v11, 0.0  ;;  %v4555_v62 = vpack.c.bf16 %v2192_v28, %v2191_v26 }
 0x346   : > { %3407 = vpow2.f32 %v1507_v30  ;;  %v1449_v47 = vsub.f32 %v4386_v10, %v1415_v4  ;;  %1582 = vadd.xlane.f32.xlu0 %v1581_v57 }
 0x347   : > { %v4520_v12 = vpop.eup %3397  ;;  %v1513_v23 = vmul.f32 1.442695, %v1450_v42 }
 0x348   : > { %v4522_v20 = vpop.eup %3399  ;;  %v1511_v6 = vmul.f32 1.442695, %v1449_v47  ;;  %v1590_v55 = vsel %vm1322_vm0, %v4520_v12, 0.0 }
 0x349   : > { %3409 = vpow2.f32 %v1513_v23  ;;  %1591 = vadd.xlane.f32.xlu1 %v1590_v55  ;;  %v1587_v2 = vsel %vm1322_vm0, %v4522_v20, 0.0 }
 0x34a   : > { %3411 = vpow2.f32 %v1511_v6  ;;  %1588 = vadd.xlane.f32.xlu0 %v1587_v2 }
 0x34b   : > { %v4528_v38 = vpop.eup %3401 }
 0x34c   : > { %v4530_v10 = vpop.eup %3403  ;;  %v1596_v24 = vsel %vm1322_vm0, %v4528_v38, 0.0 }
 0x34d   : > { %1597 = vadd.xlane.f32.xlu1 %v1596_v24  ;;  %v1593_v40 = vsel %vm1322_vm0, %v4530_v10, 0.0 }
 0x34e   : > { %1594 = vadd.xlane.f32.xlu0 %v1593_v40 }
 0x34f   : > { %v4536_v50 = vpop.eup %3405 }
 0x350   : > { %v4538_v25 = vpop.eup %3407  ;;  %v1602_v44 = vsel %vm1322_vm0, %v4536_v50, 0.0 }
 0x351   : > { %1603 = vadd.xlane.f32.xlu1 %v1602_v44  ;;  %v1599_v46 = vsel %vm1322_vm0, %v4538_v25, 0.0 }
 0x352   : > { %1600 = vadd.xlane.f32.xlu0 %v1599_v46 }
 0x353   : > { %v4544_v5 = vpop.eup %3409 }
 0x354   : > { %v4546_v39 = vpop.eup %3411  ;;  %v1608_v45 = vsel %vm1322_vm0, %v4544_v5, 0.0 }
 0x355   : > { %1609 = vadd.xlane.f32.xlu1 %v1608_v45  ;;  %v1605_v33 = vsel %vm1322_vm0, %v4546_v39, 0.0 }
 0x356   : > { %1606 = vadd.xlane.f32.xlu0 %v1605_v33 }
 0x38f   : > { %v1517_v48 = vpop.xlane.xlu0 %1516 }
 0x390   : > { %3413 = vrcp.f32 %v1517_v48 }
 0x393   : > { %v1520_v14 = vpop.xlane.xlu1 %1519 }
 0x394   : > { %3415 = vrcp.f32 %v1520_v14  ;;  %v1523_v43 = vpop.xlane.xlu0 %1522 }
 0x395   : > { %3417 = vrcp.f32 %v1523_v43 }
 0x397   : > { %v1526_v61 = vpop.xlane.xlu1 %1525 }
 0x398   : > { %3419 = vrcp.f32 %v1526_v61  ;;  %v1529_v37 = vpop.xlane.xlu0 %1528 }
 0x399   : > { %3421 = vrcp.f32 %v1529_v37 }
 0x39a   : > { %v3414_v56 = vpop.eup %3413 }
 0x39b   : > { %v1532_v49 = vpop.xlane.xlu1 %1531  ;;  %v1643_v22 = vmul.f32 %v3414_v56, %v4399_v34 }
 0x39c   : > { %3423 = vrcp.f32 %v1532_v49  ;;  %v1535_v18 = vpop.xlane.xlu0 %1534 }
 0x39d   : > { %3425 = vrcp.f32 %v1535_v18  ;;  %2991 = vmatprep.mubr.msk.f32.mxu0 %vm1322_vm0, %v1643_v22 }
 0x39e   : > { %v3416_v19 = vpop.eup %3415 }
 0x39f   : > { %v3418_v32 = vpop.eup %3417  ;;  %v1644_v30 = vmul.f32 %v3416_v19, %v4404_v1  ;;  %v1538_v31 = vpop.xlane.xlu1 %1537 }
 0x3a0   : > { %3427 = vrcp.f32 %v1538_v31  ;;  %v1645_v42 = vmul.f32 %v3418_v32, %v4406_v60  ;;  %v2193_v32 = vld [vmem:[#allocation7 + $0x10] sm:$0xff] }
 0x3a1   : > { %2992 = vmatmul.mubr.msk.f32.vlgmr.msra.gmra.mrb[44].mxu0 %vm1322_vm0, %v1644_v30  ;;  %v2194_v30 = vld [vmem:[#allocation7 + $0x18] sm:$0xff] }
 0x3a2   : > { %v3420_v34 = vpop.eup %3419  ;;  %3222 = vmatpush3.bf16.msra.mxu0 %v4256_v9  ;;  %2994 = vmatprep.mubr.msk.f32.mxu0 %vm1322_vm0, %v1645_v42 }
 0x3a3   : > { %v3422_v4 = vpop.eup %3421  ;;  %v1646_v57 = vmul.f32 %v3420_v34, %v4412_v3  ;;  %3228 = vmatprep.subr.bf16.mxu0 %v4555_v62 }
 0x3a4   : > { %v1647_v1 = vmul.f32 %v3422_v4, %v4414_v35  ;;  %v3231_v4 = vpack.c.bf16 %v2194_v30, %v2193_v32 }
 0x3a5   : > { %2995 = vmatmul.mubr.msk.f32.gmra.mrb[46].mxu0 %vm1322_vm0, %v1646_v57 }
 0x3a6   : > { %v3424_v47 = vpop.eup %3423  ;;  %2997 = vmatprep.mubr.msk.f32.mxu0 %vm1322_vm0, %v1647_v1  ;;  %v2195_v1 = vld [vmem:[#allocation7 + $0x20] sm:$0xff] }
 0x3a7   : > { %v3426_v60 = vpop.eup %3425  ;;  %v1648_v23 = vmul.f32 %v3424_v47, %v4420_v53  ;;  %v2196_v47 = vld [vmem:[#allocation7 + $0x28] sm:$0xff] }
 0x3a8   : > { %v1649_v6 = vmul.f32 %v3426_v60, %v4422_v58 }
 0x3a9   : > { %2998 = vmatmul.mubr.msk.f32.gmra.mrb[48].mxu0 %vm1322_vm0, %v1648_v23 }
 0x3aa   : > { %v3428_v9 = vpop.eup %3427  ;;  %3000 = vmatprep.mubr.msk.f32.mxu0 %vm1322_vm0, %v1649_v6 }
 0x3ab   : > { %v1650_v3 = vmul.f32 %v3428_v9, %v4428_v59 }
 0x3ad   : > { %3001 = vmatmul.mubr.msk.f32.gmra.mrb[50].mxu0 %vm1322_vm0, %v1650_v3 }
 0x3ae   : > { %v1544_v35 = vpop.xlane.xlu1 %1543 }
 0x3af   : > { %3429 = vrcp.f32 %v1544_v35  ;;  %v1541_v55 = vpop.xlane.xlu0 %1540  ;;  %v2197_v35 = vld [vmem:[#allocation7 + $0x30] sm:$0xff] }
 0x3b0   : > { %3431 = vrcp.f32 %v1541_v55  ;;  %v2198_v55 = vld [vmem:[#allocation7 + $0x38] sm:$0xff] }
 0x3b2   : > { %v1550_v2 = vpop.xlane.xlu1 %1549 }
 0x3b3   : > { %3433 = vrcp.f32 %v1550_v2  ;;  %v1547_v24 = vpop.xlane.xlu0 %1546 }
 0x3b4   : > { %3435 = vrcp.f32 %v1547_v24 }
 0x3b6   : > { %v1556_v53 = vpop.xlane.xlu1 %1555 }
 0x3b7   : > { %3437 = vrcp.f32 %v1556_v53  ;;  %v1553_v58 = vpop.xlane.xlu0 %1552 }
 0x3b8   : > { %3439 = vrcp.f32 %v1553_v58 }
 0x3b9   : > { %v3430_v40 = vpop.eup %3429 }
 0x3ba   : > { %v3432_v44 = vpop.eup %3431  ;;  %v1562_v46 = vpop.xlane.xlu1 %1561  ;;  %v1652_v33 = vmul.f32 %v3430_v40, %v4440_v41  ;;  %v2199_v40 = vld [vmem:[#allocation7 + $0x40] sm:$0xff] }
 0x3bb   : > { %3441 = vrcp.f32 %v1562_v46  ;;  %v1559_v45 = vpop.xlane.xlu0 %1558  ;;  %v1651_v59 = vmul.f32 %v3432_v44, %v4442_v54  ;;  %v2200_v44 = vld [vmem:[#allocation7 + $0x48] sm:$0xff] }
 0x3bc   : > { %3443 = vrcp.f32 %v1559_v45 }
 0x3bd   : > { %v3434_v48 = vpop.eup %3433  ;;  %3007 = vmatprep.mubr.msk.f32.mxu1 %vm1322_vm0, %v1651_v59 }
 0x3be   : > { %v3436_v14 = vpop.eup %3435  ;;  %3008 = vmatmul.mubr.msk.f32.vlgmr.msra.gmra.mrb[84].mxu1 %vm1322_vm0, %v1652_v33  ;;  %v1654_v61 = vmul.f32 %v3434_v48, %v4448_v15 }
 0x3bf   : > { %3226 = vmatpush3.bf16.msra.mxu1 %v4261_v17  ;;  %v1653_v43 = vmul.f32 %v3436_v14, %v4450_v16  ;;  %v2201_v14 = vld [vmem:[#allocation7 + $0x50] sm:$0xff] }
 0x3c1   : > { %v3438_v37 = vpop.eup %3437  ;;  %3010 = vmatprep.mubr.msk.f32.mxu1 %vm1322_vm0, %v1653_v43  ;;  %v2202_v43 = vld [vmem:[#allocation7 + $0x58] sm:$0xff] }
 0x3c2   : > { %v3440_v56 = vpop.eup %3439  ;;  %3011 = vmatmul.mubr.msk.f32.gmra.mrb[86].mxu1 %vm1322_vm0, %v1654_v61  ;;  %v1656_v54 = vmul.f32 %v3438_v37, %v4456_v8 }
 0x3c3   : > { %v1655_v41 = vmul.f32 %v3440_v56, %v4458_v63 }
 0x3c5   : > { %v3442_v49 = vpop.eup %3441  ;;  %3013 = vmatprep.mubr.msk.f32.mxu1 %vm1322_vm0, %v1655_v41 }
 0x3c6   : > { %v3444_v22 = vpop.eup %3443  ;;  %v1568_v18 = vpop.xlane.xlu1 %1567  ;;  %3014 = vmatmul.mubr.msk.f32.gmra.mrb[88].mxu1 %vm1322_vm0, %v1656_v54  ;;  %v1658_v16 = vmul.f32 %v3442_v49, %v4466_v21  ;;  %v2203_v49 = vld [vmem:[#allocation7 + $0x60] sm:$0xff] }
 0x3c7   : > { %3445 = vrcp.f32 %v1568_v18  ;;  %v1565_v17 = vpop.xlane.xlu0 %1564  ;;  %v1657_v15 = vmul.f32 %v3444_v22, %v4468_v29  ;;  %v2204_v22 = vld [vmem:[#allocation7 + $0x68] sm:$0xff] }
 0x3c8   : > { %3447 = vrcp.f32 %v1565_v17 }
 0x3c9   : > { %3016 = vmatprep.mubr.msk.f32.mxu1 %vm1322_vm0, %v1657_v15 }
 0x3ca   : > { %v1574_v26 = vpop.xlane.xlu1 %1573  ;;  %3017 = vmatmul.mubr.msk.f32.gmra.mrb[90].mxu1 %vm1322_vm0, %v1658_v16 }
 0x3cb   : > { %3449 = vrcp.f32 %v1574_v26  ;;  %v1571_v8 = vpop.xlane.xlu0 %1570  ;;  %v2206_v26 = vld [vmem:[#allocation7 + $0x78] sm:$0xff] }
 0x3cc   : > { %3451 = vrcp.f32 %v1571_v8 }
 0x3ce   : > { %v1580_v63 = vpop.xlane.xlu1 %1579 }
 0x3cf   : > { %3453 = vrcp.f32 %v1580_v63  ;;  %v1577_v28 = vpop.xlane.xlu0 %1576 }
 0x3d0   : > { %3455 = vrcp.f32 %v1577_v28 }
 0x3d1   : > { %v3446_v19 = vpop.eup %3445 }
 0x3d2   : > { %v3448_v31 = vpop.eup %3447  ;;  %v1586_v29 = vpop.xlane.xlu1 %1585  ;;  %v1660_v34 = vmul.f32 %v3446_v19, %v4480_v36 }
 0x3d3   : > { %3457 = vrcp.f32 %v1586_v29  ;;  %v1583_v42 = vpop.xlane.xlu0 %1582  ;;  %v1659_v21 = vmul.f32 %v3448_v31, %v4482_v0  ;;  %v3235_v0 = vpack.c.bf16 %v2196_v47, %v2195_v1 }
 0x3d4   : > { %3459 = vrcp.f32 %v1583_v42 }
 0x3d5   : > { %v3450_v57 = vpop.eup %3449  ;;  %3023 = vmatprep.mubr.msk.f32.mxu0 %vm1322_vm0, %v1659_v21 }
 0x3d6   : > { %v3452_v60 = vpop.eup %3451  ;;  %v1592_v23 = vpop.xlane.xlu1 %1591  ;;  %3024 = vmatmul.mubr.msk.f32.vlgmr.msra.gmra.mrb[52].mxu0 %vm1322_vm0, %v1660_v34  ;;  %v1662_v36 = vmul.f32 %v3450_v57, %v4490_v52  ;;  %v3239_v52 = vpack.c.bf16 %v2198_v55, %v2197_v35 }
 0x3d7   : > { %3461 = vrcp.f32 %v1592_v23  ;;  %v1589_v6 = vpop.xlane.xlu0 %1588  ;;  %v1661_v9 = vmul.f32 %v3452_v60, %v4492_v51  ;;  %3230 = vmatpush3.bf16.msra.mxu0 %v4555_v62 }
 0x3d8   : > { %3463 = vrcp.f32 %v1589_v6  ;;  %3232 = vmatprep.subr.bf16.mxu0 %v3231_v4 }
 0x3d9   : > { %v3454_v3 = vpop.eup %3453  ;;  %3026 = vmatprep.mubr.msk.f32.mxu0 %vm1322_vm0, %v1661_v9 }
 0x3da   : > { %v3456_v2 = vpop.eup %3455  ;;  %v1598_v24 = vpop.xlane.xlu1 %1597  ;;  %3027 = vmatmul.mubr.msk.f32.gmra.mrb[54].mxu0 %vm1322_vm0, %v1662_v36  ;;  %v1664_v62 = vmul.f32 %v3454_v3, %v4500_v7  ;;  %v3243_v7 = vpack.c.bf16 %v2200_v44, %v2199_v40 }
 0x3db   : > { %3465 = vrcp.f32 %v1598_v24  ;;  %v1595_v53 = vpop.xlane.xlu0 %1594  ;;  %v1663_v51 = vmul.f32 %v3456_v2, %v4502_v13  ;;  %3234 = vmatpush3.bf16.msra.mxu0 %v3231_v4 }
 0x3dc   : > { %3467 = vrcp.f32 %v1595_v53  ;;  %3236 = vmatprep.subr.bf16.mxu0 %v3235_v0 }
 0x3dd   : > { %v3458_v58 = vpop.eup %3457  ;;  %3029 = vmatprep.mubr.msk.f32.mxu0 %vm1322_vm0, %v1663_v51 }
 0x3de   : > { %v3460_v46 = vpop.eup %3459  ;;  %v1604_v45 = vpop.xlane.xlu1 %1603  ;;  %3030 = vmatmul.mubr.msk.f32.gmra.mrb[56].mxu0 %vm1322_vm0, %v1664_v62  ;;  %v1666_v13 = vmul.f32 %v3458_v58, %v4510_v27  ;;  %v3247_v27 = vpack.c.bf16 %v2202_v43, %v2201_v14  ;;  %v3478_v43 = vld [vmem:[%s3892_s14] sm:$0xff] }
 0x3df   : > { %3469 = vrcp.f32 %v1604_v45  ;;  %v1601_v59 = vpop.xlane.xlu0 %1600  ;;  %v1665_v33 = vmul.f32 %v3460_v46, %v4512_v11  ;;  %3238 = vmatpush3.bf16.msra.mxu0 %v3235_v0  ;;  %v4625_v45 = vld [vmem:[%s4782_s4] ss:$0 sm:$0xff] }
 0x3e0   : > { %3471 = vrcp.f32 %v1601_v59  ;;  %3240 = vmatprep.subr.bf16.mxu0 %v3239_v52 }
 0x3e1   : > { %v3462_v48 = vpop.eup %3461  ;;  %3032 = vmatprep.mubr.msk.f32.mxu0 %vm1322_vm0, %v1665_v33 }
 0x3e2   : > { %v3464_v61 = vpop.eup %3463  ;;  %v1610_v37 = vpop.xlane.xlu1 %1609  ;;  %3033 = vmatmul.mubr.msk.f32.gmra.mrb[58].mxu0 %vm1322_vm0, %v1666_v13  ;;  %v1668_v11 = vmul.f32 %v3462_v48, %v4520_v12  ;;  %v2205_v12 = vld [vmem:[#allocation7 + $0x70] sm:$0xff]  ;;  %v3477_v48 = vld [vmem:[%s3892_s14 + $0x8] sm:$0xff] }
 0x3e3   : > { %3473 = vrcp.f32 %v1610_v37  ;;  %v1607_v56 = vpop.xlane.xlu0 %1606  ;;  %v1667_v41 = vmul.f32 %v3464_v61, %v4522_v20  ;;  %3242 = vmatpush3.bf16.msra.mxu0 %v3239_v52  ;;  %v3251_v20 = vpack.c.bf16 %v2204_v22, %v2203_v49  ;;  %v3480_v49 = vld [vmem:[%s3892_s14 + $0x10] sm:$0xff] }
 0x3e4   : > { %3475 = vrcp.f32 %v1607_v56  ;;  %3244 = vmatprep.subr.bf16.mxu0 %v3243_v7 }
 0x3e5   : > { %v3466_v54 = vpop.eup %3465  ;;  %3039 = vmatprep.mubr.msk.f32.mxu1 %vm1322_vm0, %v1667_v41 }
 0x3e6   : > { %v3468_v18 = vpop.eup %3467  ;;  %3040 = vmatmul.mubr.msk.f32.vlgmr.msra.gmra.mrb[92].mxu1 %vm1322_vm0, %v1668_v11  ;;  %v1670_v15 = vmul.f32 %v3466_v54, %v4528_v38 }
 0x3e7   : > { %v1669_v17 = vmul.f32 %v3468_v18, %v4530_v10  ;;  %3246 = vmatpush3.bf16.msra.mxu0 %v3243_v7  ;;  %v3255_v10 = vpack.c.bf16 %v2206_v26, %v2205_v12  ;;  %v3482_v26 = vld [vmem:[%s3892_s14 + $0x20] sm:$0xff] }
 0x3e8   : > { %3248 = vmatprep.subr.bf16.mxu0 %v3247_v27 }
 0x3e9   : > { %v3470_v16 = vpop.eup %3469  ;;  %3042 = vmatprep.mubr.msk.f32.mxu1 %vm1322_vm0, %v1669_v17 }
 0x3ea   : > { %v3472_v8 = vpop.eup %3471  ;;  %3043 = vmatmul.mubr.msk.f32.gmra.mrb[94].mxu1 %vm1322_vm0, %v1670_v15  ;;  %v1672_v28 = vmul.f32 %v3470_v16, %v4536_v50  ;;  %v3481_v16 = vld [vmem:[%s3892_s14 + $0x28] sm:$0xff] }
 0x3eb   : > { %v1671_v63 = vmul.f32 %v3472_v8, %v4538_v25  ;;  %3250 = vmatpush3.bf16.msra.mxu0 %v3247_v27  ;;  %v3479_v27 = vld [vmem:[%s3892_s14 + $0x18] sm:$0xff] }
 0x3ec   : > { %3252 = vmatprep.subr.bf16.mxu0 %v3251_v20 }
 0x3ed   : > { %v3474_v19 = vpop.eup %3473  ;;  %3045 = vmatprep.mubr.msk.f32.mxu1 %vm1322_vm0, %v1671_v63 }
 0x3ee   : > { %v3476_v38 = vpop.eup %3475  ;;  %3046 = vmatmul.mubr.msk.f32.gmra.mrb[96].mxu1 %vm1322_vm0, %v1672_v28  ;;  %v1674_v30 = vmul.f32 %v3474_v19, %v4544_v5 }
 0x3ef   : > { %v1673_v32 = vmul.f32 %v3476_v38, %v4546_v39  ;;  %3254 = vmatpush3.bf16.msra.mxu0 %v3251_v20  ;;  %v3483_v38 = vld [vmem:[%s3892_s14 + $0x38] sm:$0xff] }
 0x3f0   : > { %3256 = vmatprep.subr.bf16.mxu0 %v3255_v10 }
 0x3f1   : > { %3048 = vmatprep.mubr.msk.f32.mxu1 %vm1322_vm0, %v1673_v32 }
 0x3f2   : > { %3049 = vmatmul.mubr.msk.f32.gmra.mrb[98].mxu1 %vm1322_vm0, %v1674_v30  ;;  %v3484_v30 = vld [vmem:[%s3892_s14 + $0x30] sm:$0xff] }
 0x3f3   : > { %3258 = vmatpush3.bf16.msra.mxu0 %v3255_v10 }
 0x474   : > { %v2993_v50 = vpop.f32.mrb[44].mxu0 }
 0x475   : > { %v1765_v25 = vpop.f32.mrb[45].mxu0 }
 0x476   : > { %3083 = vmatprep.mubr.f32.mxu0 %v1765_v25 }
 0x477   : > { %3084 = vmatmul.mubr.f32.vlgmr.msra.gmra.mrb[60].mxu0 %v2993_v50 }
 0x478   : > { %v2996_v31 = vpop.f32.mrb[46].mxu0 }
 0x479   : > { %v1775_v29 = vpop.f32.mrb[47].mxu0 }
 0x47a   : > { %3086 = vmatprep.mubr.f32.mxu0 %v1775_v29 }
 0x47b   : > { %3087 = vmatmul.mubr.f32.gmra.mrb[62].mxu0 %v2996_v31 }
 0x47c   : > { %v2999_v42 = vpop.f32.mrb[48].mxu0 }
 0x47d   : > { %v1785_v21 = vpop.f32.mrb[49].mxu0 }
 0x47e   : > { %3089 = vmatprep.mubr.f32.mxu0 %v1785_v21  ;;  %v3485_v21 = vld [vmem:[%s3892_s14 + $0x48] sm:$0xff] }
 0x47f   : > { %3090 = vmatmul.mubr.f32.gmra.mrb[64].mxu0 %v2999_v42 }
 0x480   : > { %v3002_v39 = vpop.f32.mrb[50].mxu0 }
 0x481   : > { %v1795_v5 = vpop.f32.mrb[51].mxu0 }
 0x482   : > { %3092 = vmatprep.mubr.f32.mxu0 %v1795_v5  ;;  %v3486_v5 = vld [vmem:[%s3892_s14 + $0x40] sm:$0xff] }
 0x483   : > { %3093 = vmatmul.mubr.f32.gmra.mrb[66].mxu0 %v3002_v39 }
 0x491   : > { %v3009_v34 = vpop.f32.mrb[84].mxu1 }
 0x492   : > { %v1894_v4 = vpop.f32.mrb[85].mxu1 }
 0x493   : > { %3095 = vmatprep.mubr.f32.mxu0 %v1894_v4 }
 0x494   : > { %3096 = vmatmul.mubr.f32.gmra.mrb[68].mxu0 %v3009_v34 }
 0x495   : > { %v3012_v57 = vpop.f32.mrb[86].mxu1 }
 0x496   : > { %v1904_v1 = vpop.f32.mrb[87].mxu1 }
 0x497   : > { %3098 = vmatprep.mubr.f32.mxu0 %v1904_v1 }
 0x498   : > { %3099 = vmatmul.mubr.f32.gmra.mrb[70].mxu0 %v3012_v57 }
 0x499   : > { %v3015_v47 = vpop.f32.mrb[88].mxu1 }
 0x49a   : > { %v1914_v60 = vpop.f32.mrb[89].mxu1 }
 0x49b   : > { %3101 = vmatprep.mubr.f32.mxu0 %v1914_v60  ;;  %v3487_v60 = vld [vmem:[%s3892_s14 + $0x58] sm:$0xff] }
 0x49c   : > { %3102 = vmatmul.mubr.f32.gmra.mrb[72].mxu0 %v3015_v47 }
 0x49d   : > { %v3018_v23 = vpop.f32.mrb[90].mxu1 }
 0x49e   : > { %v1924_v6 = vpop.f32.mrb[91].mxu1 }
 0x49f   : > { %3104 = vmatprep.mubr.f32.mxu0 %v1924_v6  ;;  %v3488_v6 = vld [vmem:[%s3892_s14 + $0x50] sm:$0xff] }
 0x4a0   : > { %3105 = vmatmul.mubr.f32.gmra.mrb[74].mxu0 %v3018_v23 }
 0x4a9   : > { %v3025_v9 = vpop.f32.mrb[52].mxu0 }
 0x4aa   : > { %v2023_v36 = vpop.f32.mrb[53].mxu0 }
 0x4ab   : > { %3107 = vmatprep.mubr.f32.mxu0 %v2023_v36 }
 0x4ac   : > { %3108 = vmatmul.mubr.f32.gmra.mrb[76].mxu0 %v3025_v9 }
 0x4ad   : > { %v3028_v0 = vpop.f32.mrb[54].mxu0 }
 0x4ae   : > { %v2033_v3 = vpop.f32.mrb[55].mxu0 }
 0x4af   : > { %3110 = vmatprep.mubr.f32.mxu0 %v2033_v3 }
 0x4b0   : > { %3111 = vmatmul.mubr.f32.gmra.mrb[78].mxu0 %v3028_v0 }
 0x4b1   : > { %v3031_v35 = vpop.f32.mrb[56].mxu0 }
 0x4b2   : > { %v2043_v55 = vpop.f32.mrb[57].mxu0 }
 0x4b3   : > { %3113 = vmatprep.mubr.f32.mxu0 %v2043_v55  ;;  %v3489_v55 = vld [vmem:[%s3892_s14 + $0x68] sm:$0xff] }
 0x4b4   : > { %3114 = vmatmul.mubr.f32.gmra.mrb[80].mxu0 %v3031_v35 }
 0x4b5   : > { %v3034_v2 = vpop.f32.mrb[58].mxu0 }
 0x4b6   : > { %v2053_v24 = vpop.f32.mrb[59].mxu0 }
 0x4b7   : > { %3116 = vmatprep.mubr.f32.mxu0 %v2053_v24  ;;  %v3490_v24 = vld [vmem:[%s3892_s14 + $0x60] sm:$0xff] }
 0x4b8   : > { %3117 = vmatmul.mubr.f32.gmra.mrb[82].mxu0 %v3034_v2 }
 0x4b9   : > { %v3041_v53 = vpop.f32.mrb[92].mxu1 }
 0x4ba   : > { %v2152_v51 = vpop.f32.mrb[93].mxu1 }
 0x4bb   : > { %3119 = vmatprep.mubr.f32.mxu0 %v2152_v51 }
 0x4bc   : > { %3120 = vmatmul.mubr.f32.gmra.mrb[84].mxu0 %v3041_v53 }
 0x4bd   : > { %v3044_v62 = vpop.f32.mrb[94].mxu1 }
 0x4be   : > { %v2162_v52 = vpop.f32.mrb[95].mxu1 }
 0x4bf   : > { %3122 = vmatprep.mubr.f32.mxu0 %v2162_v52 }
 0x4c0   : > { %3123 = vmatmul.mubr.f32.gmra.mrb[86].mxu0 %v3044_v62 }
 0x4c1   : > { %v3047_v58 = vpop.f32.mrb[96].mxu1 }
 0x4c2   : > { %v2172_v40 = vpop.f32.mrb[97].mxu1 }
 0x4c3   : > { %3125 = vmatprep.mubr.f32.mxu0 %v2172_v40  ;;  %v3491_v40 = vld [vmem:[%s3892_s14 + $0x78] sm:$0xff] }
 0x4c4   : > { %3126 = vmatmul.mubr.f32.gmra.mrb[88].mxu0 %v3047_v58 }
 0x4c5   : > { %v3050_v44 = vpop.f32.mrb[98].mxu1 }
 0x4c6   : > { %v2182_v46 = vpop.f32.mrb[99].mxu1 }
 0x4c7   : > { %3128 = vmatprep.mubr.f32.mxu0 %v2182_v46  ;;  %v3492_v46 = vld [vmem:[%s3892_s14 + $0x70] sm:$0xff] }
 0x4c8   : > { %3129 = vmatmul.mubr.f32.gmra.mrb[90].mxu0 %v3050_v44 }
 0x54a   : > { %v3085_v59 = vpop.f32.mrb[60].mxu0 }
 0x54b   : > { %v2286_v33 = vadd.f32 %v3085_v59, %v4625_v45  ;;  %v2280_v13 = vpop.f32.mrb[61].mxu0 }
 0x54c   : > { %v2281_v7 = vadd.f32 %v4625_v45, %v2280_v13 }
 0x54d   : > { %v2440_v14 = vadd.f32 %v3477_v48, %v2286_v33 }
 0x54e   : > { %v2439_v61 = vadd.f32 %v3478_v43, %v2281_v7  ;;  %v3088_v37 = vpop.f32.mrb[62].mxu0 }
 0x54f   : > { %2472 = vst [vmem:[%s4633_s10 + $0x8] sm:$0xff] %v2440_v14  ;;  %v2296_v56 = vadd.f32 %v3088_v37, %v4625_v45  ;;  %v2290_v41 = vpop.f32.mrb[63].mxu0  ;;  %v3493_v14 = vld [vmem:[%s3892_s14 + $0x88] sm:$0xff] }
 0x550   : > { %2471 = vst [vmem:[%s4633_s10] sm:$0xff] %v2439_v61  ;;  %v2291_v11 = vadd.f32 %v4625_v45, %v2290_v41  ;;  %v3494_v61 = vld [vmem:[%s3892_s14 + $0x80] sm:$0xff] }
 0x551   : > { %v2442_v54 = vadd.f32 %v3479_v27, %v2296_v56 }
 0x552   : > { %v2441_v22 = vadd.f32 %v3480_v49, %v2291_v11  ;;  %v3091_v18 = vpop.f32.mrb[64].mxu0 }
 0x553   : > { %2474 = vst [vmem:[%s4633_s10 + $0x18] sm:$0xff] %v2442_v54  ;;  %v2306_v17 = vadd.f32 %v3091_v18, %v4625_v45  ;;  %v2300_v15 = vpop.f32.mrb[65].mxu0  ;;  %v3495_v54 = vld [vmem:[%s3892_s14 + $0x98] sm:$0xff] }
 0x554   : > { %2473 = vst [vmem:[%s4633_s10 + $0x10] sm:$0xff] %v2441_v22  ;;  %v2301_v20 = vadd.f32 %v4625_v45, %v2300_v15  ;;  %v3496_v22 = vld [vmem:[%s3892_s14 + $0x90] sm:$0xff] }
 0x555   : > { %v2444_v12 = vadd.f32 %v3481_v16, %v2306_v17 }
 0x556   : > { %v2443_v8 = vadd.f32 %v3482_v26, %v2301_v20  ;;  %v3094_v63 = vpop.f32.mrb[66].mxu0 }
 0x557   : > { %2476 = vst [vmem:[%s4633_s10 + $0x28] sm:$0xff] %v2444_v12  ;;  %v2316_v28 = vadd.f32 %v3094_v63, %v4625_v45  ;;  %v2310_v10 = vpop.f32.mrb[67].mxu0  ;;  %v3497_v12 = vld [vmem:[%s3892_s14 + $0xa8] sm:$0xff] }
 0x558   : > { %2475 = vst [vmem:[%s4633_s10 + $0x20] sm:$0xff] %v2443_v8  ;;  %v2311_v19 = vadd.f32 %v4625_v45, %v2310_v10  ;;  %v3498_v8 = vld [vmem:[%s3892_s14 + $0xa0] sm:$0xff] }
 0x559   : > { %v2446_v32 = vadd.f32 %v3483_v38, %v2316_v28 }
 0x55a   : > { %v2445_v50 = vadd.f32 %v3484_v30, %v2311_v19 }
 0x55b   : > { %2478 = vst [vmem:[%s4633_s10 + $0x38] sm:$0xff] %v2446_v32  ;;  %v3499_v32 = vld [vmem:[%s3892_s14 + $0xb8] sm:$0xff] }
 0x55c   : > { %2477 = vst [vmem:[%s4633_s10 + $0x30] sm:$0xff] %v2445_v50  ;;  %v3500_v50 = vld [vmem:[%s3892_s14 + $0xb0] sm:$0xff] }
 0x567   : > { %v3097_v25 = vpop.f32.mrb[68].mxu0 }
 0x568   : > { %v2326_v31 = vadd.f32 %v3097_v25, %v4625_v45  ;;  %v2320_v29 = vpop.f32.mrb[69].mxu0 }
 0x569   : > { %v2321_v42 = vadd.f32 %v4625_v45, %v2320_v29 }
 0x56a   : > { %v2448_v39 = vadd.f32 %v3485_v21, %v2326_v31 }
 0x56b   : > { %v2447_v34 = vadd.f32 %v3486_v5, %v2321_v42  ;;  %v3100_v4 = vpop.f32.mrb[70].mxu0 }
 0x56c   : > { %2480 = vst [vmem:[%s4633_s10 + $0x48] sm:$0xff] %v2448_v39  ;;  %v2336_v57 = vadd.f32 %v3100_v4, %v4625_v45  ;;  %v2330_v1 = vpop.f32.mrb[71].mxu0  ;;  %v3501_v39 = vld [vmem:[%s3892_s14 + $0xc8] sm:$0xff] }
 0x56d   : > { %2479 = vst [vmem:[%s4633_s10 + $0x40] sm:$0xff] %v2447_v34  ;;  %v2331_v47 = vadd.f32 %v4625_v45, %v2330_v1  ;;  %v3502_v34 = vld [vmem:[%s3892_s14 + $0xc0] sm:$0xff] }
 0x56e   : > { %v2450_v23 = vadd.f32 %v3487_v60, %v2336_v57 }
 0x56f   : > { %v2449_v9 = vadd.f32 %v3488_v6, %v2331_v47  ;;  %v3103_v36 = vpop.f32.mrb[72].mxu0 }
 0x570   : > { %2482 = vst [vmem:[%s4633_s10 + $0x58] sm:$0xff] %v2450_v23  ;;  %v2346_v0 = vadd.f32 %v3103_v36, %v4625_v45  ;;  %v2340_v3 = vpop.f32.mrb[73].mxu0  ;;  %v3503_v23 = vld [vmem:[%s3892_s14 + $0xd8] sm:$0xff] }
 0x571   : > { %2481 = vst [vmem:[%s4633_s10 + $0x50] sm:$0xff] %v2449_v9  ;;  %v2341_v35 = vadd.f32 %v4625_v45, %v2340_v3  ;;  %v3504_v9 = vld [vmem:[%s3892_s14 + $0xd0] sm:$0xff] }
 0x572   : > { %v2452_v2 = vadd.f32 %v3489_v55, %v2346_v0 }
 0x573   : > { %v2451_v53 = vadd.f32 %v3490_v24, %v2341_v35  ;;  %v3106_v51 = vpop.f32.mrb[74].mxu0 }
 0x574   : > { %2484 = vst [vmem:[%s4633_s10 + $0x68] sm:$0xff] %v2452_v2  ;;  %v2356_v62 = vadd.f32 %v3106_v51, %v4625_v45  ;;  %v2350_v52 = vpop.f32.mrb[75].mxu0  ;;  %v3505_v2 = vld [vmem:[%s3892_s14 + $0xe8] sm:$0xff] }
 0x575   : > { %2483 = vst [vmem:[%s4633_s10 + $0x60] sm:$0xff] %v2451_v53  ;;  %v2351_v58 = vadd.f32 %v4625_v45, %v2350_v52  ;;  %v3506_v53 = vld [vmem:[%s3892_s14 + $0xe0] sm:$0xff] }
 0x576   : > { %v2454_v44 = vadd.f32 %v3491_v40, %v2356_v62 }
 0x577   : > { %v2453_v59 = vadd.f32 %v3492_v46, %v2351_v58 }
 0x578   : > { %2486 = vst [vmem:[%s4633_s10 + $0x78] sm:$0xff] %v2454_v44  ;;  %v3507_v44 = vld [vmem:[%s3892_s14 + $0xf8] sm:$0xff] }
 0x579   : > { %2485 = vst [vmem:[%s4633_s10 + $0x70] sm:$0xff] %v2453_v59  ;;  %v3508_v59 = vld [vmem:[%s3892_s14 + $0xf0] sm:$0xff] }
 0x57f   : > { %v3109_v33 = vpop.f32.mrb[76].mxu0 }
 0x580   : > { %v2366_v13 = vadd.f32 %v3109_v33, %v4625_v45  ;;  %v2360_v7 = vpop.f32.mrb[77].mxu0 }
 0x581   : > { %v2361_v48 = vadd.f32 %v4625_v45, %v2360_v7 }
 0x582   : > { %v2456_v43 = vadd.f32 %v3493_v14, %v2366_v13 }
 0x583   : > { %v2455_v37 = vadd.f32 %v3494_v61, %v2361_v48  ;;  %v3112_v56 = vpop.f32.mrb[78].mxu0 }
 0x584   : > { %2488 = vst [vmem:[%s4633_s10 + $0x88] sm:$0xff] %v2456_v43  ;;  %v2376_v41 = vadd.f32 %v3112_v56, %v4625_v45  ;;  %v2370_v11 = vpop.f32.mrb[79].mxu0 }
 0x585   : > { %2487 = vst [vmem:[%s4633_s10 + $0x80] sm:$0xff] %v2455_v37  ;;  %v2371_v27 = vadd.f32 %v4625_v45, %v2370_v11 }
 0x586   : > { %v2458_v49 = vadd.f32 %v3495_v54, %v2376_v41 }
 0x587   : > { %v2457_v18 = vadd.f32 %v3496_v22, %v2371_v27  ;;  %v3115_v17 = vpop.f32.mrb[80].mxu0 }
 0x588   : > { %2490 = vst [vmem:[%s4633_s10 + $0x98] sm:$0xff] %v2458_v49  ;;  %v2386_v15 = vadd.f32 %v3115_v17, %v4625_v45  ;;  %v2380_v20 = vpop.f32.mrb[81].mxu0 }
 0x589   : > { %2489 = vst [vmem:[%s4633_s10 + $0x90] sm:$0xff] %v2457_v18  ;;  %v2381_v16 = vadd.f32 %v4625_v45, %v2380_v20 }
 0x58a   : > { %v2460_v26 = vadd.f32 %v3497_v12, %v2386_v15 }
 0x58b   : > { %v2459_v63 = vadd.f32 %v3498_v8, %v2381_v16  ;;  %v3118_v28 = vpop.f32.mrb[82].mxu0 }
 0x58c   : > { %2492 = vst [vmem:[%s4633_s10 + $0xa8] sm:$0xff] %v2460_v26  ;;  %v2396_v10 = vadd.f32 %v3118_v28, %v4625_v45  ;;  %v2390_v19 = vpop.f32.mrb[83].mxu0 }
 0x58d   : > { %2491 = vst [vmem:[%s4633_s10 + $0xa0] sm:$0xff] %v2459_v63  ;;  %v2391_v38 = vadd.f32 %v4625_v45, %v2390_v19 }
 0x58e   : > { %v2462_v30 = vadd.f32 %v3499_v32, %v2396_v10 }
 0x58f   : > { %v2461_v25 = vadd.f32 %v3500_v50, %v2391_v38  ;;  %v3121_v31 = vpop.f32.mrb[84].mxu0 }
 0x590   : > { %2494 = vst [vmem:[%s4633_s10 + $0xb8] sm:$0xff] %v2462_v30  ;;  %v2406_v29 = vadd.f32 %v3121_v31, %v4625_v45  ;;  %v2400_v42 = vpop.f32.mrb[85].mxu0 }
 0x591   : > { %2493 = vst [vmem:[%s4633_s10 + $0xb0] sm:$0xff] %v2461_v25  ;;  %v2401_v21 = vadd.f32 %v4625_v45, %v2400_v42 }
 0x592   : > { %v2464_v5 = vadd.f32 %v3501_v39, %v2406_v29 }
 0x593   : > { %v2463_v4 = vadd.f32 %v3502_v34, %v2401_v21  ;;  %v3124_v57 = vpop.f32.mrb[86].mxu0 }
 0x594   : > { %2496 = vst [vmem:[%s4633_s10 + $0xc8] sm:$0xff] %v2464_v5  ;;  %v2416_v1 = vadd.f32 %v3124_v57, %v4625_v45  ;;  %v2410_v47 = vpop.f32.mrb[87].mxu0 }
 0x595   : > { %2495 = vst [vmem:[%s4633_s10 + $0xc0] sm:$0xff] %v2463_v4  ;;  %v2411_v60 = vadd.f32 %v4625_v45, %v2410_v47 }
 0x596   : > { %v2466_v6 = vadd.f32 %v3503_v23, %v2416_v1 }
 0x597   : > { %v2465_v36 = vadd.f32 %v3504_v9, %v2411_v60  ;;  %v3127_v0 = vpop.f32.mrb[88].mxu0 }
 0x598   : > { %2498 = vst [vmem:[%s4633_s10 + $0xd8] sm:$0xff] %v2466_v6  ;;  %v2426_v3 = vadd.f32 %v3127_v0, %v4625_v45  ;;  %v2420_v35 = vpop.f32.mrb[89].mxu0 }
 0x599   : > { %2497 = vst [vmem:[%s4633_s10 + $0xd0] sm:$0xff] %v2465_v36  ;;  %v2421_v55 = vadd.f32 %v4625_v45, %v2420_v35 }
 0x59a   : > { %v2468_v24 = vadd.f32 %v3505_v2, %v2426_v3 }
 0x59b   : > { %v2467_v51 = vadd.f32 %v3506_v53, %v2421_v55  ;;  %v3130_v62 = vpop.f32.mrb[90].mxu0 }
 0x59c   : > { %2500 = vst [vmem:[%s4633_s10 + $0xe8] sm:$0xff] %v2468_v24  ;;  %v2436_v52 = vadd.f32 %v3130_v62, %v4625_v45  ;;  %v2430_v58 = vpop.f32.mrb[91].mxu0 }
 0x59d   : > { %2499 = vst [vmem:[%s4633_s10 + $0xe0] sm:$0xff] %v2467_v51  ;;  %v2431_v40 = vadd.f32 %v4625_v45, %v2430_v58 }
 0x59e   : > { %v2470_v46 = vadd.f32 %v3507_v44, %v2436_v52 }
 0x59f   : > { %v2469_v33 = vadd.f32 %v3508_v59, %v2431_v40 }
 0x5a0   : > { %2502 = vst [vmem:[%s4633_s10 + $0xf8] sm:$0xff] %v2470_v46 }
 0x5a1   : > { %2501 = vst [vmem:[%s4633_s10 + $0xf0] sm:$0xff] %v2469_v33 }
 0x5a2   : > { %3608 = shalt.err (!%p3605_p2)
}
 0x5a3   : > { %s3609_s14 = scalar_lea.hbm %s4729_s11, 4096  ;;  %s3613_s12 = scalar_lea.hbm %s4783_s5, 8192 }
 0x5a4   : > { %p3610_p13 = scmp.ne.s32.totalorder %s4729_s11, %s3609_s14  ;;  %p3614_p4 = scmp.lt.u32.totalorder %s4729_s11, %s4783_s5 }
 0x5a5   : > { %p3615_p7 = scmp.lt.u32.totalorder %s3613_s12, %s3609_s14  ;;  %p3617_p11 = scmp.lt.u32.totalorder %s3609_s14, %s4729_s11 }
 0x5a6   : > { %p3611_p6 = pnand %p3610_p13, %p4797_p0 }
 0x5a7   : > { %p3616_p8 = por %p3615_p7, %p3614_p4 }
 0x5a8   : > { %p3612_p10 = pneg %p3611_p6 }
 0x5a9   : > { %p3618_p1 = por %p3617_p11, %p3616_p8 }
 0x5ab   : > { %p3619_p3 = pnand %p3618_p1, %p3612_p10 }
 0x5ad   : > { %3622 = shalt.err (!%p3619_p3)
}
 0x5ae   : > { %s3676_s28 = smov 128   ;;  %s3677_s9 = smov 8  }
 0x5af   : > { %3285 = dma.vmem_to_hbm [thread:$0]  (%p4797_p0), %s4731_s15, 4096, %s4729_s11, %s2504_s22, %s3676_s28, %s3676_s28, %s3677_s9  }
 0x5b0 PF: > { %s2533_s30 = sand.u32 1, %s3653_s18   ;;  %p4798_p5 = scmp.ne.s32.totalorder %s4788_s25, 0 }
 0x5b1   : > { %p4799_p9 = scmp.ge.s32.totalorder %s3665_s21, 2  ;;  %s2534_s23 = scalar_lea.sflag [#allocation4], %s2533_s30 }
 0x5b3   : > { %p3299_p12 = pnand %p4799_p9, %p4798_p5 }
 0x5b5   : > { %3648 = dma.done.wait (!%p3299_p12), %s2534_s23, 4096  }
 0x5b6   : > { %3650 = vsyncadd (!%p3299_p12), %s2534_s23, 4294963200  ;;  %p19_p2 = scmp.ge.s32.totalorder %s3821_s16, 4   ;;  %s4800_s18 = smov %s3657_s19 }
 0x5b7   : > { %s4801_s19 = smov %s3661_s20  ;;  %s4802_s20 = smov %s3830_s27 }
 0x5b8   : > { %s4803_s21 = smov %s3821_s16  ;;  %21 = sbr.rel (!%p19_p2) target bundleno = 6 (0x6), region = 93 }
 0x5bf   :  { %2539 = vsyncpa [#allocation3], 1 }
 0x5c0   :  { %2541 = vsyncpa [#allocation3 + $0x1], 1 }
 0x5c1   :  { %2542 = vsyncpa [#allocation6], 1 }
 0x5c2   :  { %2543 = vsyncpa [#allocation4], 1 }
 0x5c3   :  { %2545 = vsyncpa [#allocation4 + $0x1], 1 }

</bundles_post_ra>
